<compile_context>
chip_gen: v7x
topology: tpu7x:2x2x1
jax: 0.10.0
libtpu: 0.0.40
codegen_flags: <defaults>
</compile_context>

<pallas_src>
import jax
import jax.numpy as jnp
from jax.experimental import pallas as pl
from jax.experimental.pallas import tpu as pltpu

F32 = jnp.float32
BF16 = jnp.bfloat16
_LN_EPS = 1e-5
_BN_EPS = 1e-5

# ---- packed vector-slab row indices (one [N_VEC_ROWS, VEC_W] f32 VMEM input) --
R_GB1, R_GB2, R_GBP = 0, 1, 2            # GNN biases
R_RB = 3                                  # resnet fc head bias (BN folded)
R_BS, R_LSG, R_LSB = 4, 5, 6              # schnet proj bias, LN gamma, LN beta
R_BI, R_LIG, R_LIB = 7, 8, 9              # image proj
R_BG, R_LGG, R_LGB = 10, 11, 12           # gnn proj
R_AB1, R_AW2 = 13, 14                     # attention hidden bias, 2nd-layer weight row
R_GATEB1 = 15                             # 15,16,17  gate hidden biases
R_GATEW2 = 18                             # 18,19,20  gate 2nd-layer weight rows
R_HEADB = 21                              # packed head biases [fb|tb|ib|sb]
N_VEC_ROWS = 22

# ---- SMEM scalar pack indices -------------------------------------------------
S_TEMP, S_RW, S_AB2, S_GB2 = 0, 1, 4, 5
N_SCALARS = 8


def _pad128(n):
    return ((int(n) + 127) // 128) * 128


def _dot(a, b):
    return jnp.dot(a, b, preferred_element_type=jnp.float32)


def _xavier_uniform(key, shape):
    fan_in, fan_out = shape[-2], shape[-1]
    limit = (6.0 / (fan_in + fan_out)) ** 0.5
    return jax.random.uniform(key, shape, F32, -limit, limit)


# --------------------------------------------------------------------------
# Fully fused kernel wrapper: TabularGNN + ResNet fc head + fusion + heads
# --------------------------------------------------------------------------
def fused_forward(adj_norm, tabular_x, feat2048, schnet_feats, params):
    meta = params["meta"]
    P = meta["P"]
    T = meta["T"]
    TDp, GHp, GOp = meta["TDp"], meta["GHp"], meta["GOp"]
    SOp, ROp, Pp, PHp = meta["SOp"], meta["ROp"], meta["Pp"], meta["PHp"]
    OUTp, VECw = meta["OUTp"], meta["VECw"]

    B = schnet_feats.shape[0]
    Bp = ((B + 7) // 8) * 8               # f32 sublane multiple -> no retiling

    def pad2(x, r, c, dtype=None):
        x = x if dtype is None else x.astype(dtype)
        out = jnp.zeros((r, c), x.dtype)
        return out.at[:x.shape[0], :x.shape[1]].set(x)

    adj_p = pad2(adj_norm, Bp, Bp)                               # f32
    tx_p = pad2(tabular_x, Bp, TDp)                              # f32
    f2048_p = pad2(feat2048, Bp, feat2048.shape[1], BF16)        # bf16 activation
    sf_p = pad2(schnet_feats, Bp, SOp)                           # f32

    w = params["w"]
    vec = params["vec"]
    scal = params["scal"]
    inv_P = 1.0 / float(P)

    # ------------------------------- kernel -------------------------------
    def kernel(scal_ref, vec_ref, adj_ref, tx_ref,
               gw1_ref, gw2_ref, gwp_ref, f2048_ref, rhw_ref, sf_ref,
               pws_ref, pwi_ref, pwg_ref, aw1_ref, gatew1_ref, headw_ref,
               out_ref):
        def vrow(i, width):                       # (1, width) slice of the slab
            return vec_ref[i:i + 1, :width]

        # ---------- TabularGNN: GCN->ReLU->GCN->ReLU + input_proj ----------
        adj = adj_ref[...]                                        # f32 (exact)
        xb = tx_ref[...].astype(BF16)
        h = jnp.maximum(_dot(adj, _dot(xb, gw1_ref[...])) + vrow(R_GB1, GHp), 0.0)
        h = jnp.maximum(_dot(adj, _dot(h.astype(BF16), gw2_ref[...]))
                        + vrow(R_GB2, GOp), 0.0)
        gnn_feats = h + _dot(xb, gwp_ref[...]) + vrow(R_GBP, GOp)

        # ---------- ResNet fc head: Linear + BN(eval, folded) + ReLU -------
        img_feats = jnp.maximum(
            _dot(f2048_ref[...], rhw_ref[...]) + vrow(R_RB, ROp), 0.0)

        sf = sf_ref[...]

        # ---------- modality projections + LayerNorm (padded lanes stay 0) -
        def proj_ln(feats, w_ref, r_b, r_g, r_be):
            y = _dot(feats.astype(BF16), w_ref[...]) + vrow(r_b, Pp)
            s1 = jnp.sum(y, axis=-1, keepdims=True)       # padded lanes are 0
            s2 = jnp.sum(y * y, axis=-1, keepdims=True)
            mu = s1 * inv_P
            var = s2 * inv_P - mu * mu
            return (y - mu) * jax.lax.rsqrt(var + _LN_EPS) * vrow(r_g, Pp) \
                + vrow(r_be, Pp)

        proj_s = proj_ln(sf, pws_ref, R_BS, R_LSG, R_LSB)
        proj_i = proj_ln(img_feats, pwi_ref, R_BI, R_LIG, R_LIB)
        proj_g = proj_ln(gnn_feats, pwg_ref, R_BG, R_LGG, R_LGB)

        # ---------- attention: shared MLP batched over 3 modalities --------
        stacked = jnp.concatenate([proj_s, proj_i, proj_g], axis=0)  # [3Bp,Pp]
        ah = jnp.maximum(_dot(stacked.astype(BF16), aw1_ref[...])
                         + vrow(R_AB1, PHp), 0.0)
        scores = jnp.sum(ah * vrow(R_AW2, PHp), axis=-1, keepdims=True) \
            + scal_ref[S_AB2]
        inv_temp = 1.0 / jnp.clip(scal_ref[S_TEMP], 0.1, 10.0)
        s0 = scores[0:Bp] * inv_temp
        s1 = scores[Bp:2 * Bp] * inv_temp
        s2 = scores[2 * Bp:3 * Bp] * inv_temp

        # 3-way softmax on three [Bp,1] columns (no lane concat)
        mx = jnp.maximum(jnp.maximum(s0, s1), s2)
        e0, e1, e2 = jnp.exp(s0 - mx), jnp.exp(s1 - mx), jnp.exp(s2 - mx)
        inv_den = pl.reciprocal(e0 + e1 + e2, approx=True)
        a0, a1, a2 = e0 * inv_den, e1 * inv_den, e2 * inv_den
        # min-weight 0.1 clamp + renorm
        a0, a1, a2 = jnp.maximum(a0, 0.1), jnp.maximum(a1, 0.1), jnp.maximum(a2, 0.1)
        inv_sum = pl.reciprocal(a0 + a1 + a2, approx=True)
        a0, a1, a2 = a0 * inv_sum, a1 * inv_sum, a2 * inv_sum

        # ---------- per-modality sigmoid gates ------------------------------
        projs = (proj_s, proj_i, proj_g)
        gvals = []
        for m in range(3):
            hg = jnp.maximum(_dot(projs[m].astype(BF16), gatew1_ref[m])
                             + vrow(R_GATEB1 + m, PHp), 0.0)
            gv = jnp.sum(hg * vrow(R_GATEW2 + m, PHp), axis=-1, keepdims=True) \
                + scal_ref[S_GB2 + m]
            gvals.append(jax.nn.sigmoid(gv))
        g0, g1, g2 = gvals

        # ---------- combine, residual contribution, exact final renorm ------
        f0 = 0.7 * a0 + 0.3 * g0 + 0.1 * scal_ref[S_RW + 0]
        f1 = 0.7 * a1 + 0.3 * g1 + 0.1 * scal_ref[S_RW + 1]
        f2 = 0.7 * a2 + 0.3 * g2 + 0.1 * scal_ref[S_RW + 2]
        inv_tot = 1.0 / (f0 + f1 + f2)        # exact: keep sum-to-one to 1e-5
        w0, w1, w2 = f0 * inv_tot, f1 * inv_tot, f2 * inv_tot

        fused = w0 * proj_s + w1 * proj_i + w2 * proj_g

        # ---------- all heads as ONE block-diagonal matmul ------------------
        head_in = jnp.concatenate([fused, gnn_feats, img_feats, sf], axis=1)
        heads = _dot(head_in.astype(BF16), headw_ref[...]) + vrow(R_HEADB, OUTp)
        out_ref[...] = heads                                  # lane-dense store
        out_ref[:, 4 * T:4 * T + 3] = jnp.concatenate([w0, w1, w2], axis=1)

    # ------------------------------ pallas_call ----------------------------
    smem_spec = pl.BlockSpec(memory_space=pltpu.MemorySpace.SMEM)
    vmem_spec = pl.BlockSpec(memory_space=pltpu.MemorySpace.VMEM)

    args = (scal, vec, adj_p, tx_p,
            w["gw1"], w["gw2"], w["gwp"], f2048_p, w["rhw"], sf_p,
            w["ws"], w["wi"], w["wg"], w["aw1"], w["gatew1"], w["headw"])

    flops = 2 * Bp * (
        2048 * ROp + TDp * GHp + GHp * GOp + TDp * GOp + Bp * (GHp + GOp)
        + (SOp + ROp + GOp) * Pp + 6 * Pp * PHp
        + (Pp + GOp + ROp + SOp) * OUTp)
    bytes_accessed = sum(int(a.size) * a.dtype.itemsize for a in args) \
        + Bp * OUTp * 4
    cost = pl.CostEstimate(flops=int(flops), transcendentals=int(Bp * 12),
                           bytes_accessed=int(bytes_accessed))

    out = pl.pallas_call(
        kernel,
        out_shape=jax.ShapeDtypeStruct((Bp, OUTp), F32),
        in_specs=[smem_spec] + [vmem_spec] * (len(args) - 1),
        out_specs=vmem_spec,
        cost_estimate=cost,
    )(*args)

    fusion_out = out[:B, 0:T]
    tab_out = out[:B, T:2 * T]
    img_out = out[:B, 2 * T:3 * T]
    sch_out = out[:B, 3 * T:4 * T]
    final_weights = out[:B, 4 * T:4 * T + 3]
    return fusion_out, tab_out, img_out, sch_out, final_weights


# --------------------------------------------------------------------------
# plain-JAX glue: backbone stubs, adjacency normalization, parameter init
# --------------------------------------------------------------------------
def build_gcn_adjacency(edge_index, num_nodes):
    """A_hat = D^-1/2 (A + I) D^-1/2 built densely from edge_index [2, E]."""
    src, dst = edge_index[0], edge_index[1]
    a = jnp.zeros((num_nodes, num_nodes), F32).at[dst, src].set(1.0)
    a = a.at[jnp.arange(num_nodes), jnp.arange(num_nodes)].set(1.0)
    deg = jnp.sum(a, axis=1)
    dinv = jax.lax.rsqrt(jnp.maximum(deg, 1.0))
    return a * dinv[:, None] * dinv[None, :]


def schnet_stub_features(z, pos, atom_batch, num_graphs, emb_table, pos_proj):
    # TODO(synk): real SchNet (interaction blocks, RBF filters) not reimplemented;
    # deterministic atom embedding + position projection + per-graph mean pool.
    node_feat = emb_table[z] + pos @ pos_proj
    sums = jax.ops.segment_sum(node_feat, atom_batch, num_segments=num_graphs)
    counts = jax.ops.segment_sum(jnp.ones((z.shape[0], 1), F32), atom_batch,
                                 num_segments=num_graphs)
    return sums / jnp.maximum(counts, 1.0)


def resnet_backbone_stub(image_batch, backbone_proj):
    # TODO(synk): 50-layer ResNet conv backbone not reimplemented; GAP + fixed
    # random projection to the 2048-dim feature feeding the fused Pallas head.
    pooled = jnp.mean(image_batch, axis=(2, 3))          # [B, 3]
    return pooled @ backbone_proj                        # [B, 2048]


def init_params(key, *, tabular_dim, gnn_hidden, gnn_out, schnet_out,
                resnet_out, fusion_dim, num_targets):
    P, Ph, T = fusion_dim, fusion_dim // 2, num_targets
    TDp, GHp, GOp = _pad128(tabular_dim), _pad128(gnn_hidden), _pad128(gnn_out)
    SOp, ROp = _pad128(schnet_out), _pad128(resnet_out)
    Pp, PHp = _pad128(P), _pad128(Ph)
    OUTp = _pad128(4 * T + 3)
    VECw = max(TDp, GHp, GOp, SOp, ROp, Pp, PHp, OUTp)

    keys = iter(jax.random.split(key, 32))

    def xav(shape):
        return _xavier_uniform(next(keys), shape)

    def padw(m, r, c):
        return jnp.zeros((r, c), F32).at[:m.shape[0], :m.shape[1]].set(m)

    # logical weights (PyTorch init: xavier_uniform for Linear, zero biases,
    # BN gamma=1/beta=0, running mean=0/var=1, temperature=1, residual=0.3)
    gw1, gw2, gwp = xav((tabular_dim, gnn_hidden)), xav((gnn_hidden, gnn_out)), \
        xav((tabular_dim, gnn_out))
    rhw = xav((2048, resnet_out))
    bn_scale = jnp.ones((resnet_out,), F32) * jax.lax.rsqrt(
        jnp.ones((resnet_out,), F32) + _BN_EPS)          # g / sqrt(var+eps)
    rhw_folded = rhw * bn_scale[None, :]                 # fold BN into weight
    rb_folded = jnp.zeros((resnet_out,), F32)            # (b - mean)*scale + beta

    ws, wi, wg = xav((schnet_out, P)), xav((resnet_out, P)), xav((gnn_out, P))
    aw1, aw2 = xav((P, Ph)), xav((Ph, 1))
    gate_w1 = [xav((P, Ph)) for _ in range(3)]
    gate_w2 = [xav((Ph, 1)) for _ in range(3)]
    fw, tw = xav((P, T)), xav((gnn_out, T))
    iw, sw = xav((resnet_out, T)), xav((schnet_out, T))

    # ---- packed vector slab (one VMEM DMA) --------------------------------
    vec = jnp.zeros((N_VEC_ROWS, VECw), F32)
    vec = vec.at[R_LSG, :P].set(1.0)
    vec = vec.at[R_LIG, :P].set(1.0)
    vec = vec.at[R_LGG, :P].set(1.0)
    vec = vec.at[R_RB, :resnet_out].set(rb_folded)
    vec = vec.at[R_AW2, :Ph].set(aw2[:, 0])              # pre-transposed
    for m in range(3):
        vec = vec.at[R_GATEW2 + m, :Ph].set(gate_w2[m][:, 0])
    # all bias rows (GNN, proj, attn hidden, gate hidden, head) are zero-init.

    # ---- block-diagonal head weight (one matmul for 4 heads) ---------------
    headw = jnp.zeros((Pp + GOp + ROp + SOp, OUTp), F32)
    headw = headw.at[0:P, 0:T].set(fw)
    headw = headw.at[Pp:Pp + gnn_out, T:2 * T].set(tw)
    headw = headw.at[Pp + GOp:Pp + GOp + resnet_out, 2 * T:3 * T].set(iw)
    headw = headw.at[Pp + GOp + ROp:Pp + GOp + ROp + schnet_out, 3 * T:4 * T].set(sw)

    # ---- pre-padded, pre-bf16 weight matrices (no per-call casts) ----------
    weights = {
        "gw1": padw(gw1, TDp, GHp).astype(BF16),
        "gw2": padw(gw2, GHp, GOp).astype(BF16),
        "gwp": padw(gwp, TDp, GOp).astype(BF16),
        "rhw": padw(rhw_folded, 2048, ROp).astype(BF16),
        "ws": padw(ws, SOp, Pp).astype(BF16),
        "wi": padw(wi, ROp, Pp).astype(BF16),
        "wg": padw(wg, GOp, Pp).astype(BF16),
        "aw1": padw(aw1, Pp, PHp).astype(BF16),
        "gatew1": jnp.stack([padw(gate_w1[m], Pp, PHp) for m in range(3)]).astype(BF16),
        "headw": headw.astype(BF16),
    }

    # ---- SMEM scalar pack ---------------------------------------------------
    scal = jnp.zeros((N_SCALARS,), F32)
    scal = scal.at[S_TEMP].set(1.0)                      # temperature
    scal = scal.at[S_RW:S_RW + 3].set(0.3)               # residual_weights
    # attention 2nd-layer bias and gate 2nd-layer biases are zero-init.

    stubs = {
        "emb_table": 0.1 * jax.random.normal(next(keys), (100, schnet_out), F32),
        "pos_proj": 0.1 * jax.random.normal(next(keys), (3, schnet_out), F32),
        "img_backbone": 0.1 * jax.random.normal(next(keys), (3, 2048), F32),
    }
    meta = dict(P=P, T=T, TDp=TDp, GHp=GHp, GOp=GOp, SOp=SOp, ROp=ROp,
                Pp=Pp, PHp=PHp, OUTp=OUTp, VECw=VECw)
    return {"w": weights, "vec": vec, "scal": scal, "stubs": stubs, "meta": meta}


def multimodal_forward(params, z, pos, atom_batch, image_batch,
                       tabular_x, edge_index, tabular_batch):
    num_graphs = image_batch.shape[0]
    num_nodes = tabular_x.shape[0]

    schnet_feats = schnet_stub_features(z, pos, atom_batch, num_graphs,
                                        params["stubs"]["emb_table"],
                                        params["stubs"]["pos_proj"])
    feat2048 = resnet_backbone_stub(image_batch, params["stubs"]["img_backbone"])
    adj_norm = build_gcn_adjacency(edge_index, num_nodes)

    # single fused Pallas kernel: GNN + ResNet head + fusion + all heads
    return fused_forward(adj_norm, tabular_x, feat2048, schnet_feats, params)


# --------------------------------------------------------------------------
if __name__ == "__main__":
    B = 8                 # batch size == number of tabular graph nodes
    TABULAR_DIM = 16
    GNN_HIDDEN = 32
    GNN_OUT = 24
    SCHNET_OUT = 24
    RESNET_OUT = 24
    FUSION_DIM = 32
    NUM_TARGETS = 4
    N_ATOMS = 3 * B

    key = jax.random.PRNGKey(0)
    k_param, k_img, k_tab, k_pos, k_z = jax.random.split(key, 5)

    params = init_params(
        k_param, tabular_dim=TABULAR_DIM, gnn_hidden=GNN_HIDDEN, gnn_out=GNN_OUT,
        schnet_out=SCHNET_OUT, resnet_out=RESNET_OUT, fusion_dim=FUSION_DIM,
        num_targets=NUM_TARGETS)

    # SchNet-style molecular input
    z = jax.random.randint(k_z, (N_ATOMS,), 1, 10)
    pos = jax.random.normal(k_pos, (N_ATOMS, 3), F32)
    atom_batch = jnp.repeat(jnp.arange(B, dtype=jnp.int32), N_ATOMS // B)

    # image input (NCHW)
    image_batch = jax.random.normal(k_img, (B, 3, 32, 32), F32)

    # tabular graph: B nodes in a ring (symmetric edges)
    tabular_x = jax.random.normal(k_tab, (B, TABULAR_DIM), F32)
    nodes = jnp.arange(B, dtype=jnp.int32)
    nxt = (nodes + 1) % B
    edge_index = jnp.stack([jnp.concatenate([nodes, nxt]),
                            jnp.concatenate([nxt, nodes])], axis=0)
    tabular_batch = nodes

    outs = multimodal_forward(params, z, pos, atom_batch, image_batch,
                              tabular_x, edge_index, tabular_batch)
    outs = jax.block_until_ready(outs)

    fusion_out, tab_out, img_out, sch_out, final_weights = outs
    assert fusion_out.shape == (B, NUM_TARGETS)
    assert tab_out.shape == (B, NUM_TARGETS)
    assert img_out.shape == (B, NUM_TARGETS)
    assert sch_out.shape == (B, NUM_TARGETS)
    assert final_weights.shape == (B, 3)
    # final weights must sum to 1 per row (exact divide kept in-kernel)
    assert bool(jnp.allclose(jnp.sum(final_weights, axis=1), 1.0, atol=1e-5))
    assert all(bool(jnp.all(jnp.isfinite(o))) for o in outs)

    print("KERNEL_OK")
</pallas_src>

<mosaic_0001>
module attributes {stable_mosaic.version = 11 : i64} {
  func.func @kernel(%arg0: memref<8xf32, #tpu.memory_space<smem>>, %arg1: memref<22x128xf32, #tpu.memory_space<vmem>>, %arg2: memref<8x8xf32, #tpu.memory_space<vmem>>, %arg3: memref<8x128xf32, #tpu.memory_space<vmem>>, %arg4: memref<128x128xbf16, #tpu.memory_space<vmem>>, %arg5: memref<128x128xbf16, #tpu.memory_space<vmem>>, %arg6: memref<128x128xbf16, #tpu.memory_space<vmem>>, %arg7: memref<8x2048xbf16, #tpu.memory_space<vmem>>, %arg8: memref<2048x128xbf16, #tpu.memory_space<vmem>>, %arg9: memref<8x128xf32, #tpu.memory_space<vmem>>, %arg10: memref<128x128xbf16, #tpu.memory_space<vmem>>, %arg11: memref<128x128xbf16, #tpu.memory_space<vmem>>, %arg12: memref<128x128xbf16, #tpu.memory_space<vmem>>, %arg13: memref<128x128xbf16, #tpu.memory_space<vmem>>, %arg14: memref<3x128x128xbf16, #tpu.memory_space<vmem>>, %arg15: memref<512x128xbf16, #tpu.memory_space<vmem>>, %arg16: memref<8x128xf32, #tpu.memory_space<vmem>>) attributes {dimension_semantics = [], scalar_prefetch = 0 : i64, scratch_operands = 0 : i64, tpu.core_type = #tpu.core_type<tc>} {
    %c0 = arith.constant 0 : index
    %c0_0 = arith.constant 0 : index
    %0 = vector.load %arg2[%c0, %c0_0] : memref<8x8xf32, #tpu.memory_space<vmem>>, vector<8x8xf32>
    %c0_1 = arith.constant 0 : index
    %c0_2 = arith.constant 0 : index
    %1 = vector.load %arg3[%c0_1, %c0_2] : memref<8x128xf32, #tpu.memory_space<vmem>>, vector<8x128xf32>
    %2 = arith.truncf %1 : vector<8x128xf32> to vector<8x128xbf16>
    %c0_3 = arith.constant 0 : index
    %c0_4 = arith.constant 0 : index
    %3 = vector.load %arg4[%c0_3, %c0_4] : memref<128x128xbf16, #tpu.memory_space<vmem>>, vector<128x128xbf16>
    %cst = arith.constant dense<0.000000e+00> : vector<8x128xf32>
    %4 = tpu.matmul %2, %3, %cst {dimension_numbers = #tpu.dot_dimension_numbers<[1], [0], [0], [1], [0, 0, 1, 1], [], []>} : vector<8x128xbf16>, vector<128x128xbf16>, vector<8x128xf32> -> vector<8x128xf32>
    %cst_5 = arith.constant dense<0.000000e+00> : vector<8x128xf32>
    %5 = tpu.matmul %0, %4, %cst_5 {dimension_numbers = #tpu.dot_dimension_numbers<[1], [0], [0], [1], [0, 0, 1, 1], [], []>} : vector<8x8xf32>, vector<8x128xf32>, vector<8x128xf32> -> vector<8x128xf32>
    %c0_6 = arith.constant 0 : index
    %c0_7 = arith.constant 0 : index
    %6 = vector.load %arg1[%c0_6, %c0_7] : memref<22x128xf32, #tpu.memory_space<vmem>>, vector<1x128xf32>
    %7 = vector.broadcast %6 : vector<1x128xf32> to vector<8x128xf32>
    %8 = arith.addf %5, %7 : vector<8x128xf32>
    %cst_8 = arith.constant 0.000000e+00 : f32
    %9 = vector.broadcast %cst_8 : f32 to vector<8x128xf32>
    %10 = arith.maximumf %8, %9 : vector<8x128xf32>
    %11 = arith.truncf %10 : vector<8x128xf32> to vector<8x128xbf16>
    %c0_9 = arith.constant 0 : index
    %c0_10 = arith.constant 0 : index
    %12 = vector.load %arg5[%c0_9, %c0_10] : memref<128x128xbf16, #tpu.memory_space<vmem>>, vector<128x128xbf16>
    %cst_11 = arith.constant dense<0.000000e+00> : vector<8x128xf32>
    %13 = tpu.matmul %11, %12, %cst_11 {dimension_numbers = #tpu.dot_dimension_numbers<[1], [0], [0], [1], [0, 0, 1, 1], [], []>} : vector<8x128xbf16>, vector<128x128xbf16>, vector<8x128xf32> -> vector<8x128xf32>
    %cst_12 = arith.constant dense<0.000000e+00> : vector<8x128xf32>
    %14 = tpu.matmul %0, %13, %cst_12 {dimension_numbers = #tpu.dot_dimension_numbers<[1], [0], [0], [1], [0, 0, 1, 1], [], []>} : vector<8x8xf32>, vector<8x128xf32>, vector<8x128xf32> -> vector<8x128xf32>
    %c1 = arith.constant 1 : index
    %c0_13 = arith.constant 0 : index
    %15 = vector.load %arg1[%c1, %c0_13] : memref<22x128xf32, #tpu.memory_space<vmem>>, vector<1x128xf32>
    %16 = vector.broadcast %15 : vector<1x128xf32> to vector<8x128xf32>
    %17 = arith.addf %14, %16 : vector<8x128xf32>
    %cst_14 = arith.constant 0.000000e+00 : f32
    %18 = vector.broadcast %cst_14 : f32 to vector<8x128xf32>
    %19 = arith.maximumf %17, %18 : vector<8x128xf32>
    %c0_15 = arith.constant 0 : index
    %c0_16 = arith.constant 0 : index
    %20 = vector.load %arg6[%c0_15, %c0_16] : memref<128x128xbf16, #tpu.memory_space<vmem>>, vector<128x128xbf16>
    %cst_17 = arith.constant dense<0.000000e+00> : vector<8x128xf32>
    %21 = tpu.matmul %2, %20, %cst_17 {dimension_numbers = #tpu.dot_dimension_numbers<[1], [0], [0], [1], [0, 0, 1, 1], [], []>} : vector<8x128xbf16>, vector<128x128xbf16>, vector<8x128xf32> -> vector<8x128xf32>
    %22 = arith.addf %19, %21 : vector<8x128xf32>
    %c2 = arith.constant 2 : index
    %c0_18 = arith.constant 0 : index
    %23 = vector.load %arg1[%c2, %c0_18] : memref<22x128xf32, #tpu.memory_space<vmem>>, vector<1x128xf32>
    %24 = vector.broadcast %23 : vector<1x128xf32> to vector<8x128xf32>
    %25 = arith.addf %22, %24 : vector<8x128xf32>
    %c0_19 = arith.constant 0 : index
    %c0_20 = arith.constant 0 : index
    %26 = vector.load %arg7[%c0_19, %c0_20] : memref<8x2048xbf16, #tpu.memory_space<vmem>>, vector<8x2048xbf16>
    %c0_21 = arith.constant 0 : index
    %c0_22 = arith.constant 0 : index
    %27 = vector.load %arg8[%c0_21, %c0_22] : memref<2048x128xbf16, #tpu.memory_space<vmem>>, vector<2048x128xbf16>
    %cst_23 = arith.constant dense<0.000000e+00> : vector<8x128xf32>
    %28 = tpu.matmul %26, %27, %cst_23 {dimension_numbers = #tpu.dot_dimension_numbers<[1], [0], [0], [1], [0, 0, 1, 1], [], []>} : vector<8x2048xbf16>, vector<2048x128xbf16>, vector<8x128xf32> -> vector<8x128xf32>
    %c3 = arith.constant 3 : index
    %c0_24 = arith.constant 0 : index
    %29 = vector.load %arg1[%c3, %c0_24] : memref<22x128xf32, #tpu.memory_space<vmem>>, vector<1x128xf32>
    %30 = vector.broadcast %29 : vector<1x128xf32> to vector<8x128xf32>
    %31 = arith.addf %28, %30 : vector<8x128xf32>
    %cst_25 = arith.constant 0.000000e+00 : f32
    %32 = vector.broadcast %cst_25 : f32 to vector<8x128xf32>
    %33 = arith.maximumf %31, %32 : vector<8x128xf32>
    %c0_26 = arith.constant 0 : index
    %c0_27 = arith.constant 0 : index
    %34 = vector.load %arg9[%c0_26, %c0_27] : memref<8x128xf32, #tpu.memory_space<vmem>>, vector<8x128xf32>
    %35 = arith.truncf %34 : vector<8x128xf32> to vector<8x128xbf16>
    %c0_28 = arith.constant 0 : index
    %c0_29 = arith.constant 0 : index
    %36 = vector.load %arg10[%c0_28, %c0_29] : memref<128x128xbf16, #tpu.memory_space<vmem>>, vector<128x128xbf16>
    %cst_30 = arith.constant dense<0.000000e+00> : vector<8x128xf32>
    %37 = tpu.matmul %35, %36, %cst_30 {dimension_numbers = #tpu.dot_dimension_numbers<[1], [0], [0], [1], [0, 0, 1, 1], [], []>} : vector<8x128xbf16>, vector<128x128xbf16>, vector<8x128xf32> -> vector<8x128xf32>
    %c4 = arith.constant 4 : index
    %c0_31 = arith.constant 0 : index
    %38 = vector.load %arg1[%c4, %c0_31] : memref<22x128xf32, #tpu.memory_space<vmem>>, vector<1x128xf32>
    %39 = vector.broadcast %38 : vector<1x128xf32> to vector<8x128xf32>
    %40 = arith.addf %37, %39 : vector<8x128xf32>
    %cst_32 = arith.constant dense<0.000000e+00> : vector<8xf32>
    %41 = vector.multi_reduction <add>, %40, %cst_32 [1] : vector<8x128xf32> to vector<8xf32>
    %42 = vector.shape_cast %41 : vector<8xf32> to vector<8x1xf32>
    %43 = arith.mulf %40, %40 : vector<8x128xf32>
    %cst_33 = arith.constant dense<0.000000e+00> : vector<8xf32>
    %44 = vector.multi_reduction <add>, %43, %cst_33 [1] : vector<8x128xf32> to vector<8xf32>
    %45 = vector.shape_cast %44 : vector<8xf32> to vector<8x1xf32>
    %cst_34 = arith.constant 3.125000e-02 : f32
    %46 = vector.broadcast %cst_34 : f32 to vector<8x1xf32>
    %47 = arith.mulf %42, %46 : vector<8x1xf32>
    %cst_35 = arith.constant 3.125000e-02 : f32
    %48 = vector.broadcast %cst_35 : f32 to vector<8x1xf32>
    %49 = arith.mulf %45, %48 : vector<8x1xf32>
    %50 = arith.mulf %47, %47 : vector<8x1xf32>
    %51 = arith.subf %49, %50 : vector<8x1xf32>
    %52 = vector.broadcast %47 : vector<8x1xf32> to vector<8x128xf32>
    %53 = arith.subf %40, %52 : vector<8x128xf32>
    %cst_36 = arith.constant 9.99999974E-6 : f32
    %54 = vector.broadcast %cst_36 : f32 to vector<8x1xf32>
    %55 = arith.addf %51, %54 : vector<8x1xf32>
    %56 = math.rsqrt %55 : vector<8x1xf32>
    %57 = vector.broadcast %56 : vector<8x1xf32> to vector<8x128xf32>
    %58 = arith.mulf %53, %57 : vector<8x128xf32>
    %c5 = arith.constant 5 : index
    %c0_37 = arith.constant 0 : index
    %59 = vector.load %arg1[%c5, %c0_37] : memref<22x128xf32, #tpu.memory_space<vmem>>, vector<1x128xf32>
    %60 = vector.broadcast %59 : vector<1x128xf32> to vector<8x128xf32>
    %61 = arith.mulf %58, %60 : vector<8x128xf32>
    %c6 = arith.constant 6 : index
    %c0_38 = arith.constant 0 : index
    %62 = vector.load %arg1[%c6, %c0_38] : memref<22x128xf32, #tpu.memory_space<vmem>>, vector<1x128xf32>
    %63 = vector.broadcast %62 : vector<1x128xf32> to vector<8x128xf32>
    %64 = arith.addf %61, %63 : vector<8x128xf32>
    %65 = arith.truncf %33 : vector<8x128xf32> to vector<8x128xbf16>
    %c0_39 = arith.constant 0 : index
    %c0_40 = arith.constant 0 : index
    %66 = vector.load %arg11[%c0_39, %c0_40] : memref<128x128xbf16, #tpu.memory_space<vmem>>, vector<128x128xbf16>
    %cst_41 = arith.constant dense<0.000000e+00> : vector<8x128xf32>
    %67 = tpu.matmul %65, %66, %cst_41 {dimension_numbers = #tpu.dot_dimension_numbers<[1], [0], [0], [1], [0, 0, 1, 1], [], []>} : vector<8x128xbf16>, vector<128x128xbf16>, vector<8x128xf32> -> vector<8x128xf32>
    %c7 = arith.constant 7 : index
    %c0_42 = arith.constant 0 : index
    %68 = vector.load %arg1[%c7, %c0_42] : memref<22x128xf32, #tpu.memory_space<vmem>>, vector<1x128xf32>
    %69 = vector.broadcast %68 : vector<1x128xf32> to vector<8x128xf32>
    %70 = arith.addf %67, %69 : vector<8x128xf32>
    %cst_43 = arith.constant dense<0.000000e+00> : vector<8xf32>
    %71 = vector.multi_reduction <add>, %70, %cst_43 [1] : vector<8x128xf32> to vector<8xf32>
    %72 = vector.shape_cast %71 : vector<8xf32> to vector<8x1xf32>
    %73 = arith.mulf %70, %70 : vector<8x128xf32>
    %cst_44 = arith.constant dense<0.000000e+00> : vector<8xf32>
    %74 = vector.multi_reduction <add>, %73, %cst_44 [1] : vector<8x128xf32> to vector<8xf32>
    %75 = vector.shape_cast %74 : vector<8xf32> to vector<8x1xf32>
    %cst_45 = arith.constant 3.125000e-02 : f32
    %76 = vector.broadcast %cst_45 : f32 to vector<8x1xf32>
    %77 = arith.mulf %72, %76 : vector<8x1xf32>
    %cst_46 = arith.constant 3.125000e-02 : f32
    %78 = vector.broadcast %cst_46 : f32 to vector<8x1xf32>
    %79 = arith.mulf %75, %78 : vector<8x1xf32>
    %80 = arith.mulf %77, %77 : vector<8x1xf32>
    %81 = arith.subf %79, %80 : vector<8x1xf32>
    %82 = vector.broadcast %77 : vector<8x1xf32> to vector<8x128xf32>
    %83 = arith.subf %70, %82 : vector<8x128xf32>
    %cst_47 = arith.constant 9.99999974E-6 : f32
    %84 = vector.broadcast %cst_47 : f32 to vector<8x1xf32>
    %85 = arith.addf %81, %84 : vector<8x1xf32>
    %86 = math.rsqrt %85 : vector<8x1xf32>
    %87 = vector.broadcast %86 : vector<8x1xf32> to vector<8x128xf32>
    %88 = arith.mulf %83, %87 : vector<8x128xf32>
    %c8 = arith.constant 8 : index
    %c0_48 = arith.constant 0 : index
    %89 = vector.load %arg1[%c8, %c0_48] : memref<22x128xf32, #tpu.memory_space<vmem>>, vector<1x128xf32>
    %90 = vector.broadcast %89 : vector<1x128xf32> to vector<8x128xf32>
    %91 = arith.mulf %88, %90 : vector<8x128xf32>
    %c9 = arith.constant 9 : index
    %c0_49 = arith.constant 0 : index
    %92 = vector.load %arg1[%c9, %c0_49] : memref<22x128xf32, #tpu.memory_space<vmem>>, vector<1x128xf32>
    %93 = vector.broadcast %92 : vector<1x128xf32> to vector<8x128xf32>
    %94 = arith.addf %91, %93 : vector<8x128xf32>
    %95 = arith.truncf %25 : vector<8x128xf32> to vector<8x128xbf16>
    %c0_50 = arith.constant 0 : index
    %c0_51 = arith.constant 0 : index
    %96 = vector.load %arg12[%c0_50, %c0_51] : memref<128x128xbf16, #tpu.memory_space<vmem>>, vector<128x128xbf16>
    %cst_52 = arith.constant dense<0.000000e+00> : vector<8x128xf32>
    %97 = tpu.matmul %95, %96, %cst_52 {dimension_numbers = #tpu.dot_dimension_numbers<[1], [0], [0], [1], [0, 0, 1, 1], [], []>} : vector<8x128xbf16>, vector<128x128xbf16>, vector<8x128xf32> -> vector<8x128xf32>
    %c10 = arith.constant 10 : index
    %c0_53 = arith.constant 0 : index
    %98 = vector.load %arg1[%c10, %c0_53] : memref<22x128xf32, #tpu.memory_space<vmem>>, vector<1x128xf32>
    %99 = vector.broadcast %98 : vector<1x128xf32> to vector<8x128xf32>
    %100 = arith.addf %97, %99 : vector<8x128xf32>
    %cst_54 = arith.constant dense<0.000000e+00> : vector<8xf32>
    %101 = vector.multi_reduction <add>, %100, %cst_54 [1] : vector<8x128xf32> to vector<8xf32>
    %102 = vector.shape_cast %101 : vector<8xf32> to vector<8x1xf32>
    %103 = arith.mulf %100, %100 : vector<8x128xf32>
    %cst_55 = arith.constant dense<0.000000e+00> : vector<8xf32>
    %104 = vector.multi_reduction <add>, %103, %cst_55 [1] : vector<8x128xf32> to vector<8xf32>
    %105 = vector.shape_cast %104 : vector<8xf32> to vector<8x1xf32>
    %cst_56 = arith.constant 3.125000e-02 : f32
    %106 = vector.broadcast %cst_56 : f32 to vector<8x1xf32>
    %107 = arith.mulf %102, %106 : vector<8x1xf32>
    %cst_57 = arith.constant 3.125000e-02 : f32
    %108 = vector.broadcast %cst_57 : f32 to vector<8x1xf32>
    %109 = arith.mulf %105, %108 : vector<8x1xf32>
    %110 = arith.mulf %107, %107 : vector<8x1xf32>
    %111 = arith.subf %109, %110 : vector<8x1xf32>
    %112 = vector.broadcast %107 : vector<8x1xf32> to vector<8x128xf32>
    %113 = arith.subf %100, %112 : vector<8x128xf32>
    %cst_58 = arith.constant 9.99999974E-6 : f32
    %114 = vector.broadcast %cst_58 : f32 to vector<8x1xf32>
    %115 = arith.addf %111, %114 : vector<8x1xf32>
    %116 = math.rsqrt %115 : vector<8x1xf32>
    %117 = vector.broadcast %116 : vector<8x1xf32> to vector<8x128xf32>
    %118 = arith.mulf %113, %117 : vector<8x128xf32>
    %c11 = arith.constant 11 : index
    %c0_59 = arith.constant 0 : index
    %119 = vector.load %arg1[%c11, %c0_59] : memref<22x128xf32, #tpu.memory_space<vmem>>, vector<1x128xf32>
    %120 = vector.broadcast %119 : vector<1x128xf32> to vector<8x128xf32>
    %121 = arith.mulf %118, %120 : vector<8x128xf32>
    %c12 = arith.constant 12 : index
    %c0_60 = arith.constant 0 : index
    %122 = vector.load %arg1[%c12, %c0_60] : memref<22x128xf32, #tpu.memory_space<vmem>>, vector<1x128xf32>
    %123 = vector.broadcast %122 : vector<1x128xf32> to vector<8x128xf32>
    %124 = arith.addf %121, %123 : vector<8x128xf32>
    %125 = tpu.concatenate %64, %94, %124 in 0 : vector<8x128xf32>, vector<8x128xf32>, vector<8x128xf32> -> vector<24x128xf32>
    %126 = arith.truncf %125 : vector<24x128xf32> to vector<24x128xbf16>
    %c0_61 = arith.constant 0 : index
    %c0_62 = arith.constant 0 : index
    %127 = vector.load %arg13[%c0_61, %c0_62] : memref<128x128xbf16, #tpu.memory_space<vmem>>, vector<128x128xbf16>
    %cst_63 = arith.constant dense<0.000000e+00> : vector<24x128xf32>
    %128 = tpu.matmul %126, %127, %cst_63 {dimension_numbers = #tpu.dot_dimension_numbers<[1], [0], [0], [1], [0, 0, 1, 1], [], []>} : vector<24x128xbf16>, vector<128x128xbf16>, vector<24x128xf32> -> vector<24x128xf32>
    %c13 = arith.constant 13 : index
    %c0_64 = arith.constant 0 : index
    %129 = vector.load %arg1[%c13, %c0_64] : memref<22x128xf32, #tpu.memory_space<vmem>>, vector<1x128xf32>
    %130 = vector.broadcast %129 : vector<1x128xf32> to vector<24x128xf32>
    %131 = arith.addf %128, %130 : vector<24x128xf32>
    %cst_65 = arith.constant 0.000000e+00 : f32
    %132 = vector.broadcast %cst_65 : f32 to vector<24x128xf32>
    %133 = arith.maximumf %131, %132 : vector<24x128xf32>
    %c14 = arith.constant 14 : index
    %c0_66 = arith.constant 0 : index
    %134 = vector.load %arg1[%c14, %c0_66] : memref<22x128xf32, #tpu.memory_space<vmem>>, vector<1x128xf32>
    %135 = vector.broadcast %134 : vector<1x128xf32> to vector<24x128xf32>
    %136 = arith.mulf %133, %135 : vector<24x128xf32>
    %cst_67 = arith.constant dense<0.000000e+00> : vector<24xf32>
    %137 = vector.multi_reduction <add>, %136, %cst_67 [1] : vector<24x128xf32> to vector<24xf32>
    %138 = vector.shape_cast %137 : vector<24xf32> to vector<24x1xf32>
    %c4_68 = arith.constant 4 : index
    %139 = memref.load %arg0[%c4_68] : memref<8xf32, #tpu.memory_space<smem>>
    %140 = vector.broadcast %139 : f32 to vector<24x1xf32>
    %141 = arith.addf %138, %140 : vector<24x1xf32>
    %c0_69 = arith.constant 0 : index
    %142 = memref.load %arg0[%c0_69] : memref<8xf32, #tpu.memory_space<smem>>
    %cst_70 = arith.constant 1.000000e-01 : f32
    %cst_71 = arith.constant 1.000000e+01 : f32
    %143 = arith.maximumf %cst_70, %142 : f32
    %144 = arith.minimumf %cst_71, %143 : f32
    %cst_72 = arith.constant 1.000000e+00 : f32
    %145 = arith.divf %cst_72, %144 : f32
    %146 = vector.extract_strided_slice %141 {offsets = [0, 0], sizes = [8, 1], strides = [1, 1]} : vector<24x1xf32> to vector<8x1xf32>
    %147 = vector.broadcast %145 : f32 to vector<8x1xf32>
    %148 = arith.mulf %146, %147 : vector<8x1xf32>
    %149 = vector.extract_strided_slice %141 {offsets = [8, 0], sizes = [8, 1], strides = [1, 1]} : vector<24x1xf32> to vector<8x1xf32>
    %150 = vector.broadcast %145 : f32 to vector<8x1xf32>
    %151 = arith.mulf %149, %150 : vector<8x1xf32>
    %152 = vector.extract_strided_slice %141 {offsets = [16, 0], sizes = [8, 1], strides = [1, 1]} : vector<24x1xf32> to vector<8x1xf32>
    %153 = vector.broadcast %145 : f32 to vector<8x1xf32>
    %154 = arith.mulf %152, %153 : vector<8x1xf32>
    %155 = arith.maximumf %148, %151 : vector<8x1xf32>
    %156 = arith.maximumf %155, %154 : vector<8x1xf32>
    %157 = arith.subf %148, %156 : vector<8x1xf32>
    %158 = math.exp %157 : vector<8x1xf32>
    %159 = arith.subf %151, %156 : vector<8x1xf32>
    %160 = math.exp %159 : vector<8x1xf32>
    %161 = arith.subf %154, %156 : vector<8x1xf32>
    %162 = math.exp %161 : vector<8x1xf32>
    %163 = arith.addf %158, %160 : vector<8x1xf32>
    %164 = arith.addf %163, %162 : vector<8x1xf32>
    %165 = tpu.reciprocal %164 {approx = true} : vector<8x1xf32> -> vector<8x1xf32>
    %166 = arith.mulf %158, %165 : vector<8x1xf32>
    %167 = arith.mulf %160, %165 : vector<8x1xf32>
    %168 = arith.mulf %162, %165 : vector<8x1xf32>
    %cst_73 = arith.constant 1.000000e-01 : f32
    %169 = vector.broadcast %cst_73 : f32 to vector<8x1xf32>
    %170 = arith.maximumf %166, %169 : vector<8x1xf32>
    %cst_74 = arith.constant 1.000000e-01 : f32
    %171 = vector.broadcast %cst_74 : f32 to vector<8x1xf32>
    %172 = arith.maximumf %167, %171 : vector<8x1xf32>
    %cst_75 = arith.constant 1.000000e-01 : f32
    %173 = vector.broadcast %cst_75 : f32 to vector<8x1xf32>
    %174 = arith.maximumf %168, %173 : vector<8x1xf32>
    %175 = arith.addf %170, %172 : vector<8x1xf32>
    %176 = arith.addf %175, %174 : vector<8x1xf32>
    %177 = tpu.reciprocal %176 {approx = true} : vector<8x1xf32> -> vector<8x1xf32>
    %178 = arith.mulf %170, %177 : vector<8x1xf32>
    %179 = arith.mulf %172, %177 : vector<8x1xf32>
    %180 = arith.mulf %174, %177 : vector<8x1xf32>
    %181 = arith.truncf %64 : vector<8x128xf32> to vector<8x128xbf16>
    %c0_76 = arith.constant 0 : index
    %c0_77 = arith.constant 0 : index
    %c0_78 = arith.constant 0 : index
    %182 = vector.load %arg14[%c0_76, %c0_77, %c0_78] : memref<3x128x128xbf16, #tpu.memory_space<vmem>>, vector<1x128x128xbf16>
    %183 = vector.shape_cast %182 : vector<1x128x128xbf16> to vector<128x128xbf16>
    %cst_79 = arith.constant dense<0.000000e+00> : vector<8x128xf32>
    %184 = tpu.matmul %181, %183, %cst_79 {dimension_numbers = #tpu.dot_dimension_numbers<[1], [0], [0], [1], [0, 0, 1, 1], [], []>} : vector<8x128xbf16>, vector<128x128xbf16>, vector<8x128xf32> -> vector<8x128xf32>
    %c15 = arith.constant 15 : index
    %c0_80 = arith.constant 0 : index
    %185 = vector.load %arg1[%c15, %c0_80] : memref<22x128xf32, #tpu.memory_space<vmem>>, vector<1x128xf32>
    %186 = vector.broadcast %185 : vector<1x128xf32> to vector<8x128xf32>
    %187 = arith.addf %184, %186 : vector<8x128xf32>
    %cst_81 = arith.constant 0.000000e+00 : f32
    %188 = vector.broadcast %cst_81 : f32 to vector<8x128xf32>
    %189 = arith.maximumf %187, %188 : vector<8x128xf32>
    %c18 = arith.constant 18 : index
    %c0_82 = arith.constant 0 : index
    %190 = vector.load %arg1[%c18, %c0_82] : memref<22x128xf32, #tpu.memory_space<vmem>>, vector<1x128xf32>
    %191 = vector.broadcast %190 : vector<1x128xf32> to vector<8x128xf32>
    %192 = arith.mulf %189, %191 : vector<8x128xf32>
    %cst_83 = arith.constant dense<0.000000e+00> : vector<8xf32>
    %193 = vector.multi_reduction <add>, %192, %cst_83 [1] : vector<8x128xf32> to vector<8xf32>
    %194 = vector.shape_cast %193 : vector<8xf32> to vector<8x1xf32>
    %c5_84 = arith.constant 5 : index
    %195 = memref.load %arg0[%c5_84] : memref<8xf32, #tpu.memory_space<smem>>
    %196 = vector.broadcast %195 : f32 to vector<8x1xf32>
    %197 = arith.addf %194, %196 : vector<8x1xf32>
    %198 = arith.negf %197 : vector<8x1xf32>
    %199 = math.exp %198 : vector<8x1xf32>
    %cst_85 = arith.constant 1.000000e+00 : f32
    %200 = vector.broadcast %cst_85 : f32 to vector<8x1xf32>
    %201 = arith.addf %200, %199 : vector<8x1xf32>
    %202 = arith.divf %200, %201 : vector<8x1xf32>
    %203 = arith.truncf %94 : vector<8x128xf32> to vector<8x128xbf16>
    %c1_86 = arith.constant 1 : index
    %c0_87 = arith.constant 0 : index
    %c0_88 = arith.constant 0 : index
    %204 = vector.load %arg14[%c1_86, %c0_87, %c0_88] : memref<3x128x128xbf16, #tpu.memory_space<vmem>>, vector<1x128x128xbf16>
    %205 = vector.shape_cast %204 : vector<1x128x128xbf16> to vector<128x128xbf16>
    %cst_89 = arith.constant dense<0.000000e+00> : vector<8x128xf32>
    %206 = tpu.matmul %203, %205, %cst_89 {dimension_numbers = #tpu.dot_dimension_numbers<[1], [0], [0], [1], [0, 0, 1, 1], [], []>} : vector<8x128xbf16>, vector<128x128xbf16>, vector<8x128xf32> -> vector<8x128xf32>
    %c16 = arith.constant 16 : index
    %c0_90 = arith.constant 0 : index
    %207 = vector.load %arg1[%c16, %c0_90] : memref<22x128xf32, #tpu.memory_space<vmem>>, vector<1x128xf32>
    %208 = vector.broadcast %207 : vector<1x128xf32> to vector<8x128xf32>
    %209 = arith.addf %206, %208 : vector<8x128xf32>
    %cst_91 = arith.constant 0.000000e+00 : f32
    %210 = vector.broadcast %cst_91 : f32 to vector<8x128xf32>
    %211 = arith.maximumf %209, %210 : vector<8x128xf32>
    %c19 = arith.constant 19 : index
    %c0_92 = arith.constant 0 : index
    %212 = vector.load %arg1[%c19, %c0_92] : memref<22x128xf32, #tpu.memory_space<vmem>>, vector<1x128xf32>
    %213 = vector.broadcast %212 : vector<1x128xf32> to vector<8x128xf32>
    %214 = arith.mulf %211, %213 : vector<8x128xf32>
    %cst_93 = arith.constant dense<0.000000e+00> : vector<8xf32>
    %215 = vector.multi_reduction <add>, %214, %cst_93 [1] : vector<8x128xf32> to vector<8xf32>
    %216 = vector.shape_cast %215 : vector<8xf32> to vector<8x1xf32>
    %c6_94 = arith.constant 6 : index
    %217 = memref.load %arg0[%c6_94] : memref<8xf32, #tpu.memory_space<smem>>
    %218 = vector.broadcast %217 : f32 to vector<8x1xf32>
    %219 = arith.addf %216, %218 : vector<8x1xf32>
    %220 = arith.negf %219 : vector<8x1xf32>
    %221 = math.exp %220 : vector<8x1xf32>
    %cst_95 = arith.constant 1.000000e+00 : f32
    %222 = vector.broadcast %cst_95 : f32 to vector<8x1xf32>
    %223 = arith.addf %222, %221 : vector<8x1xf32>
    %224 = arith.divf %222, %223 : vector<8x1xf32>
    %225 = arith.truncf %124 : vector<8x128xf32> to vector<8x128xbf16>
    %c2_96 = arith.constant 2 : index
    %c0_97 = arith.constant 0 : index
    %c0_98 = arith.constant 0 : index
    %226 = vector.load %arg14[%c2_96, %c0_97, %c0_98] : memref<3x128x128xbf16, #tpu.memory_space<vmem>>, vector<1x128x128xbf16>
    %227 = vector.shape_cast %226 : vector<1x128x128xbf16> to vector<128x128xbf16>
    %cst_99 = arith.constant dense<0.000000e+00> : vector<8x128xf32>
    %228 = tpu.matmul %225, %227, %cst_99 {dimension_numbers = #tpu.dot_dimension_numbers<[1], [0], [0], [1], [0, 0, 1, 1], [], []>} : vector<8x128xbf16>, vector<128x128xbf16>, vector<8x128xf32> -> vector<8x128xf32>
    %c17 = arith.constant 17 : index
    %c0_100 = arith.constant 0 : index
    %229 = vector.load %arg1[%c17, %c0_100] : memref<22x128xf32, #tpu.memory_space<vmem>>, vector<1x128xf32>
    %230 = vector.broadcast %229 : vector<1x128xf32> to vector<8x128xf32>
    %231 = arith.addf %228, %230 : vector<8x128xf32>
    %cst_101 = arith.constant 0.000000e+00 : f32
    %232 = vector.broadcast %cst_101 : f32 to vector<8x128xf32>
    %233 = arith.maximumf %231, %232 : vector<8x128xf32>
    %c20 = arith.constant 20 : index
    %c0_102 = arith.constant 0 : index
    %234 = vector.load %arg1[%c20, %c0_102] : memref<22x128xf32, #tpu.memory_space<vmem>>, vector<1x128xf32>
    %235 = vector.broadcast %234 : vector<1x128xf32> to vector<8x128xf32>
    %236 = arith.mulf %233, %235 : vector<8x128xf32>
    %cst_103 = arith.constant dense<0.000000e+00> : vector<8xf32>
    %237 = vector.multi_reduction <add>, %236, %cst_103 [1] : vector<8x128xf32> to vector<8xf32>
    %238 = vector.shape_cast %237 : vector<8xf32> to vector<8x1xf32>
    %c7_104 = arith.constant 7 : index
    %239 = memref.load %arg0[%c7_104] : memref<8xf32, #tpu.memory_space<smem>>
    %240 = vector.broadcast %239 : f32 to vector<8x1xf32>
    %241 = arith.addf %238, %240 : vector<8x1xf32>
    %242 = arith.negf %241 : vector<8x1xf32>
    %243 = math.exp %242 : vector<8x1xf32>
    %cst_105 = arith.constant 1.000000e+00 : f32
    %244 = vector.broadcast %cst_105 : f32 to vector<8x1xf32>
    %245 = arith.addf %244, %243 : vector<8x1xf32>
    %246 = arith.divf %244, %245 : vector<8x1xf32>
    %cst_106 = arith.constant 0.699999988 : f32
    %247 = vector.broadcast %cst_106 : f32 to vector<8x1xf32>
    %248 = arith.mulf %247, %178 : vector<8x1xf32>
    %cst_107 = arith.constant 3.000000e-01 : f32
    %249 = vector.broadcast %cst_107 : f32 to vector<8x1xf32>
    %250 = arith.mulf %249, %202 : vector<8x1xf32>
    %251 = arith.addf %248, %250 : vector<8x1xf32>
    %c1_108 = arith.constant 1 : index
    %252 = memref.load %arg0[%c1_108] : memref<8xf32, #tpu.memory_space<smem>>
    %cst_109 = arith.constant 1.000000e-01 : f32
    %253 = arith.mulf %cst_109, %252 : f32
    %254 = vector.broadcast %253 : f32 to vector<8x1xf32>
    %255 = arith.addf %251, %254 : vector<8x1xf32>
    %cst_110 = arith.constant 0.699999988 : f32
    %256 = vector.broadcast %cst_110 : f32 to vector<8x1xf32>
    %257 = arith.mulf %256, %179 : vector<8x1xf32>
    %cst_111 = arith.constant 3.000000e-01 : f32
    %258 = vector.broadcast %cst_111 : f32 to vector<8x1xf32>
    %259 = arith.mulf %258, %224 : vector<8x1xf32>
    %260 = arith.addf %257, %259 : vector<8x1xf32>
    %c2_112 = arith.constant 2 : index
    %261 = memref.load %arg0[%c2_112] : memref<8xf32, #tpu.memory_space<smem>>
    %cst_113 = arith.constant 1.000000e-01 : f32
    %262 = arith.mulf %cst_113, %261 : f32
    %263 = vector.broadcast %262 : f32 to vector<8x1xf32>
    %264 = arith.addf %260, %263 : vector<8x1xf32>
    %cst_114 = arith.constant 0.699999988 : f32
    %265 = vector.broadcast %cst_114 : f32 to vector<8x1xf32>
    %266 = arith.mulf %265, %180 : vector<8x1xf32>
    %cst_115 = arith.constant 3.000000e-01 : f32
    %267 = vector.broadcast %cst_115 : f32 to vector<8x1xf32>
    %268 = arith.mulf %267, %246 : vector<8x1xf32>
    %269 = arith.addf %266, %268 : vector<8x1xf32>
    %c3_116 = arith.constant 3 : index
    %270 = memref.load %arg0[%c3_116] : memref<8xf32, #tpu.memory_space<smem>>
    %cst_117 = arith.constant 1.000000e-01 : f32
    %271 = arith.mulf %cst_117, %270 : f32
    %272 = vector.broadcast %271 : f32 to vector<8x1xf32>
    %273 = arith.addf %269, %272 : vector<8x1xf32>
    %274 = arith.addf %255, %264 : vector<8x1xf32>
    %275 = arith.addf %274, %273 : vector<8x1xf32>
    %cst_118 = arith.constant 1.000000e+00 : f32
    %276 = vector.broadcast %cst_118 : f32 to vector<8x1xf32>
    %277 = arith.divf %276, %275 : vector<8x1xf32>
    %278 = arith.mulf %255, %277 : vector<8x1xf32>
    %279 = arith.mulf %264, %277 : vector<8x1xf32>
    %280 = arith.mulf %273, %277 : vector<8x1xf32>
    %281 = vector.broadcast %278 : vector<8x1xf32> to vector<8x128xf32>
    %282 = arith.mulf %281, %64 : vector<8x128xf32>
    %283 = vector.broadcast %279 : vector<8x1xf32> to vector<8x128xf32>
    %284 = arith.mulf %283, %94 : vector<8x128xf32>
    %285 = arith.addf %282, %284 : vector<8x128xf32>
    %286 = vector.broadcast %280 : vector<8x1xf32> to vector<8x128xf32>
    %287 = arith.mulf %286, %124 : vector<8x128xf32>
    %288 = arith.addf %285, %287 : vector<8x128xf32>
    %289 = tpu.concatenate %288, %25, %33, %34 in 1 : vector<8x128xf32>, vector<8x128xf32>, vector<8x128xf32>, vector<8x128xf32> -> vector<8x512xf32>
    %290 = arith.truncf %289 : vector<8x512xf32> to vector<8x512xbf16>
    %c0_119 = arith.constant 0 : index
    %c0_120 = arith.constant 0 : index
    %291 = vector.load %arg15[%c0_119, %c0_120] : memref<512x128xbf16, #tpu.memory_space<vmem>>, vector<512x128xbf16>
    %cst_121 = arith.constant dense<0.000000e+00> : vector<8x128xf32>
    %292 = tpu.matmul %290, %291, %cst_121 {dimension_numbers = #tpu.dot_dimension_numbers<[1], [0], [0], [1], [0, 0, 1, 1], [], []>} : vector<8x512xbf16>, vector<512x128xbf16>, vector<8x128xf32> -> vector<8x128xf32>
    %c21 = arith.constant 21 : index
    %c0_122 = arith.constant 0 : index
    %293 = vector.load %arg1[%c21, %c0_122] : memref<22x128xf32, #tpu.memory_space<vmem>>, vector<1x128xf32>
    %294 = vector.broadcast %293 : vector<1x128xf32> to vector<8x128xf32>
    %295 = arith.addf %292, %294 : vector<8x128xf32>
    %c0_123 = arith.constant 0 : index
    %c0_124 = arith.constant 0 : index
    %296 = vector.load %arg16[%c0_123, %c0_124] : memref<8x128xf32, #tpu.memory_space<vmem>>, vector<8x128xf32>
    tpu.vector_store %arg16[%c0_123, %c0_124], %295 {strides = array<i32>} : memref<8x128xf32, #tpu.memory_space<vmem>>, vector<8x128xf32>,
    %297 = tpu.concatenate %278, %279, %280 in 1 : vector<8x1xf32>, vector<8x1xf32>, vector<8x1xf32> -> vector<8x3xf32>
    %c0_125 = arith.constant 0 : index
    %c16_126 = arith.constant 16 : index
    %298 = vector.load %arg16[%c0_125, %c16_126] : memref<8x128xf32, #tpu.memory_space<vmem>>, vector<8x3xf32>
    tpu.vector_store %arg16[%c0_125, %c16_126], %297 {strides = array<i32>} : memref<8x128xf32, #tpu.memory_space<vmem>>, vector<8x3xf32>,
    return
  }
}

</mosaic_0001>

<bundles_post_ra>
// kernel: tpu_custom_call.1
= control target key start
LH: loop header
LB: loop body
LE: loop exit
PB: predicated region body
PF: predicated region fallthrough
CT: control target
= control target key end

     0   :  { %s5480_s0 = inlined_call_operand.hbm [shape: f32[8], index: 0, kind: input, shape index: {}]   ;;  %s5481_s1 = inlined_call_operand.hbm [shape: f32[22,128], index: 1, kind: input, shape index: {}]   ;;  %s5482_s2 = inlined_call_operand.hbm [shape: f32[8,8], index: 2, kind: input, shape index: {}]   ;;  %s5483_s3 = inlined_call_operand.vmem [shape: f32[8,128], index: 3, kind: input, shape index: {}]   ;;  %s5484_s4 = inlined_call_operand.hbm [shape: bf16[128,128], index: 4, kind: input, shape index: {}]   ;;  %s5485_s5 = inlined_call_operand.hbm [shape: bf16[128,128], index: 5, kind: input, shape index: {}]   ;;  %s5486_s6 = inlined_call_operand.hbm [shape: bf16[128,128], index: 6, kind: input, shape index: {}]   ;;  %s5487_s7 = inlined_call_operand.hbm [shape: bf16[8,2048], index: 7, kind: input, shape index: {}]   ;;  %s5488_s8 = inlined_call_operand.hbm [shape: bf16[2048,128], index: 8, kind: input, shape index: {}]   ;;  %s5489_s9 = inlined_call_operand.vmem [shape: f32[8,128], index: 9, kind: input, shape index: {}]   ;;  %s5490_s10 = inlined_call_operand.hbm [shape: bf16[128,128], index: 10, kind: input, shape index: {}]   ;;  %s5491_s11 = inlined_call_operand.hbm [shape: bf16[128,128], index: 11, kind: input, shape index: {}]   ;;  %s5492_s12 = inlined_call_operand.hbm [shape: bf16[128,128], index: 12, kind: input, shape index: {}]   ;;  %s5493_s13 = inlined_call_operand.hbm [shape: bf16[128,128], index: 13, kind: input, shape index: {}]   ;;  %s5494_s14 = inlined_call_operand.hbm [shape: bf16[3,128,128], index: 14, kind: input, shape index: {}]   ;;  %s5495_s15 = inlined_call_operand.hbm [shape: bf16[512,128], index: 15, kind: input, shape index: {}]   ;;  %s5496_s16 = inlined_call_operand.hbm [shape: f32[8,128], index: 16, kind: output, shape index: {}]  }
   0x1   :  { %5498 = sst [smem:[#allocation35_spill]] %s5480_s0 }
   0x2   :  { %21 = vsyncpa [#allocation5], 0 }
   0x3   :  { %22 = vsyncpa [#allocation3], 0 }
   0x4   :  { %23 = vsyncpa [#allocation8], 0 }
   0x5   :  { %24 = vsyncpa [#allocation11], 0 }
   0x6   :  { %25 = vsyncpa [#allocation14], 0 }
   0x7   :  { %26 = vsyncpa [#allocation17], 0 }
   0x8   :  { %27 = vsyncpa [#allocation20], 0 }
   0x9   :  { %28 = vsyncpa [#allocation23], 0 }
   0xa   :  { %29 = vsyncpa [#allocation4], 0  ;;  %s4972_s21 = smov [#allocation7]   ;;  %s4636_s25 = scalar_lea.hbm %s5482_s2, 128 }
   0xb   :  { %s56_s22 = sshll.u32 %s4972_s21, 4  ;;  %p4637_p0 = scmp.ne.s32.totalorder %s5482_s2, %s4636_s25  ;;  %s57_s22 = int_to_ptr.vmem [resolvable:$true] %s56_s22 }
   0xc   :  { %p4640_p1 = scmp.lt.u32.totalorder %s4636_s25, %s5482_s2 }
   0xe   :  { %p4642_p2 = pnand %p4640_p1, %p4637_p0 }
  0x10   :  { %4645 = shalt.err (!%p4642_p2)
}
  0x11   :  { %s4646_s30 = scalar_lea.vmem %s57_s22, 128  ;;  %p4651_p4 = scmp.lt.s32.totalorder %s57_s22, %s57_s22 }
  0x12   :  { %p4647_p3 = scmp.ne.s32.totalorder %s57_s22, %s4646_s30  ;;  %p4652_p5 = scmp.lt.s32.totalorder %s4646_s30, %s4646_s30 }
  0x14   :  { %p4653_p6 = por %p4652_p5, %p4651_p4 }
  0x16   :  { %p4654_p7 = pnand %p4653_p6, %p4647_p3 }
  0x18   :  { %4657 = shalt.err (!%p4654_p7)
}
  0x19   :  { %59 = dma.hbm_to_vmem [thread:$0]  %s5482_s2, 128, %s57_s22, [#allocation8]  }
  0x1a   :  { %s4973_s18 = smov [#allocation10]   ;;  %s4974_s20 = smov [#allocation13]  }
  0x1b   :  { %s79_s19 = sshll.u32 %s4973_s18, 4  ;;  %s104_s21 = sshll.u32 %s4974_s20, 4  ;;  %s80_s19 = int_to_ptr.vmem [resolvable:$true] %s79_s19  ;;  %s105_s21 = int_to_ptr.vmem [resolvable:$true] %s104_s21 }
  0x1c   :  { %s4658_s25 = scalar_lea.hbm %s5485_s5, 1024 }
  0x1d   :  { %p4659_p8 = scmp.ne.s32.totalorder %s5485_s5, %s4658_s25  ;;  %p4662_p9 = scmp.lt.u32.totalorder %s4658_s25, %s5485_s5 }
  0x1f   :  { %p4664_p10 = pnand %p4662_p9, %p4659_p8 }
  0x21   :  { %4667 = shalt.err (!%p4664_p10)
}
  0x22   :  { %s4668_s2 = scalar_lea.vmem %s80_s19, 1024  ;;  %p4673_p12 = scmp.lt.s32.totalorder %s80_s19, %s80_s19 }
  0x23   :  { %p4669_p11 = scmp.ne.s32.totalorder %s80_s19, %s4668_s2  ;;  %p4674_p13 = scmp.lt.s32.totalorder %s4668_s2, %s4668_s2 }
  0x25   :  { %p4675_p0 = por %p4674_p13, %p4673_p12 }
  0x27   :  { %p4676_p1 = pnand %p4675_p0, %p4669_p11 }
  0x29   :  { %4679 = shalt.err (!%p4676_p1)
}
  0x2a   :  { %s4975_s22 = smov 64   ;;  %s4976_s30 = smov 4  }
  0x2b   :  { %85 = dma.hbm_to_vmem [thread:$0]  %s5485_s5, 1024, %s80_s19, [#allocation11], %s4975_s22, %s4975_s22, %s4976_s30  }
  0x2c   :  { %s4680_s23 = scalar_lea.hbm %s5487_s7, 1024 }
  0x2d   :  { %p4681_p2 = scmp.ne.s32.totalorder %s5487_s7, %s4680_s23  ;;  %p4684_p3 = scmp.lt.u32.totalorder %s4680_s23, %s5487_s7 }
  0x2f   :  { %p4686_p4 = pnand %p4684_p3, %p4681_p2 }
  0x31   :  { %4689 = shalt.err (!%p4686_p4)
}
  0x32   :  { %s4690_s28 = scalar_lea.vmem %s105_s21, 1024  ;;  %p4695_p6 = scmp.lt.s32.totalorder %s105_s21, %s105_s21 }
  0x33   :  { %p4691_p5 = scmp.ne.s32.totalorder %s105_s21, %s4690_s28  ;;  %p4696_p7 = scmp.lt.s32.totalorder %s4690_s28, %s4690_s28 }
  0x35   :  { %p4697_p8 = por %p4696_p7, %p4695_p6 }
  0x37   :  { %p4698_p9 = pnand %p4697_p8, %p4691_p5 }
  0x39   :  { %4701 = shalt.err (!%p4698_p9)
}
  0x3a   :  { %107 = dma.hbm_to_vmem [thread:$0]  %s5487_s7, 1024, %s105_s21, [#allocation14]  }
  0x3b   :  { %s4977_s29 = smov [#allocation16]   ;;  %s4978_s0 = smov [#allocation19]  }
  0x3c   :  { %s127_s2 = sshll.u32 %s4977_s29, 4  ;;  %s151_s17 = sshll.u32 %s4978_s0, 4  ;;  %s128_s2 = int_to_ptr.vmem [resolvable:$true] %s127_s2  ;;  %s152_s17 = int_to_ptr.vmem [resolvable:$true] %s151_s17 }
  0x3d   :  { %s4702_s23 = scalar_lea.hbm %s5490_s10, 1024 }
  0x3e   :  { %p4703_p10 = scmp.ne.s32.totalorder %s5490_s10, %s4702_s23  ;;  %p4706_p11 = scmp.lt.u32.totalorder %s4702_s23, %s5490_s10 }
  0x40   :  { %p4708_p12 = pnand %p4706_p11, %p4703_p10 }
  0x42   :  { %4711 = shalt.err (!%p4708_p12)
}
  0x43   :  { %s4712_s7 = scalar_lea.vmem %s128_s2, 1024  ;;  %p4717_p0 = scmp.lt.s32.totalorder %s128_s2, %s128_s2 }
  0x44   :  { %p4713_p13 = scmp.ne.s32.totalorder %s128_s2, %s4712_s7  ;;  %p4718_p1 = scmp.lt.s32.totalorder %s4712_s7, %s4712_s7 }
  0x46   :  { %p4719_p2 = por %p4718_p1, %p4717_p0 }
  0x48   :  { %p4720_p3 = pnand %p4719_p2, %p4713_p13 }
  0x4a   :  { %4723 = shalt.err (!%p4720_p3)
}
  0x4b   :  { %133 = dma.hbm_to_vmem [thread:$0]  %s5490_s10, 1024, %s128_s2, [#allocation17], %s4975_s22, %s4975_s22, %s4976_s30  }
  0x4c   :  { %s4724_s29 = scalar_lea.hbm %s5492_s12, 1024 }
  0x4d   :  { %p4725_p4 = scmp.ne.s32.totalorder %s5492_s12, %s4724_s29  ;;  %p4728_p5 = scmp.lt.u32.totalorder %s4724_s29, %s5492_s12 }
  0x4f   :  { %p4730_p6 = pnand %p4728_p5, %p4725_p4 }
  0x51   :  { %4733 = shalt.err (!%p4730_p6)
}
  0x52   :  { %s4734_s24 = scalar_lea.vmem %s152_s17, 1024  ;;  %p4739_p8 = scmp.lt.s32.totalorder %s152_s17, %s152_s17 }
  0x53   :  { %p4735_p7 = scmp.ne.s32.totalorder %s152_s17, %s4734_s24  ;;  %p4740_p9 = scmp.lt.s32.totalorder %s4734_s24, %s4734_s24 }
  0x55   :  { %p4741_p10 = por %p4740_p9, %p4739_p8 }
  0x57   :  { %p4742_p11 = pnand %p4741_p10, %p4735_p7 }
  0x59   :  { %4745 = shalt.err (!%p4742_p11)
}
  0x5a   :  { %157 = dma.hbm_to_vmem [thread:$0]  %s5492_s12, 1024, %s152_s17, [#allocation20], %s4975_s22, %s4975_s22, %s4976_s30  }
  0x5b   :  { %s4979_s25 = smov [#allocation22]   ;;  %s4746_s21 = scalar_lea.hbm %s5494_s14, 3072 }
  0x5c   :  { %s175_s26 = sshll.u32 %s4979_s25, 4  ;;  %p4747_p12 = scmp.ne.s32.totalorder %s5494_s14, %s4746_s21  ;;  %s176_s26 = int_to_ptr.vmem [resolvable:$true] %s175_s26 }
  0x5d   :  { %p4750_p13 = scmp.lt.u32.totalorder %s4746_s21, %s5494_s14 }
  0x5f   :  { %p4752_p0 = pnand %p4750_p13, %p4747_p12 }
  0x61   :  { %4755 = shalt.err (!%p4752_p0)
}
  0x62   :  { %s4756_s0 = scalar_lea.vmem %s176_s26, 3072  ;;  %p4761_p2 = scmp.lt.s32.totalorder %s176_s26, %s176_s26 }
  0x63   :  { %p4757_p1 = scmp.ne.s32.totalorder %s176_s26, %s4756_s0  ;;  %p4762_p3 = scmp.lt.s32.totalorder %s4756_s0, %s4756_s0 }
  0x65   :  { %p4763_p4 = por %p4762_p3, %p4761_p2 }
  0x67   :  { %p4764_p5 = pnand %p4763_p4, %p4757_p1 }
  0x69   :  { %4767 = shalt.err (!%p4764_p5)
}
  0x6a   :  { %181 = dma.hbm_to_vmem [thread:$0]  %s5494_s14, 3072, %s176_s26, [#allocation23], %s4975_s22, %s4975_s22, %s4976_s30  }
  0x6b   :  { %s5499_s23 = sld [smem:[#allocation35_spill]] }
  0x71   :  { %s4768_s24 = scalar_lea.hbm %s5499_s23, 16 }
  0x72   :  { %p4769_p6 = scmp.ne.s32.totalorder %s5499_s23, %s4768_s24  ;;  %p4772_p7 = scmp.lt.u32.totalorder %s4768_s24, %s5499_s23 }
  0x74   :  { %p4774_p8 = pnand %p4772_p7, %p4769_p6 }
  0x76   :  { %4777 = shalt.err (!%p4774_p8)
}
  0x77   :  { %s4980_s7 = smov [#allocation2]   ;;  %s4981_s14 = smov [#allocation6]  }
  0x78   :  { %37 = dma.hbm_to_smem %s5499_s23, 16, %s4980_s7, [#allocation5]  }
  0x79   :  { %s43_s26 = sshll.u32 %s4981_s14, 4  ;;  %s4778_s29 = scalar_lea.hbm %s5481_s1, 384  ;;  %s44_s26 = int_to_ptr.vmem [resolvable:$true] %s43_s26 }
  0x7a   :  { %p4779_p9 = scmp.ne.s32.totalorder %s5481_s1, %s4778_s29  ;;  %p4782_p10 = scmp.lt.u32.totalorder %s4778_s29, %s5481_s1 }
  0x7c   :  { %p4784_p11 = pnand %p4782_p10, %p4779_p9 }
  0x7e   :  { %4787 = shalt.err (!%p4784_p11)
}
  0x7f   :  { %s4788_s20 = scalar_lea.vmem %s44_s26, 384  ;;  %p4793_p13 = scmp.lt.s32.totalorder %s44_s26, %s44_s26 }
  0x80   :  { %p4789_p12 = scmp.ne.s32.totalorder %s44_s26, %s4788_s20  ;;  %p4794_p0 = scmp.lt.s32.totalorder %s4788_s20, %s4788_s20 }
  0x82   :  { %p4795_p1 = por %p4794_p0, %p4793_p13 }
  0x84   :  { %p4796_p2 = pnand %p4795_p1, %p4789_p12 }
  0x86   :  { %4799 = shalt.err (!%p4796_p2)
}
  0x87   :  { %s4982_s23 = smov 128   ;;  %s4983_s24 = smov 8  }
  0x88   :  { %49 = dma.hbm_to_vmem [thread:$0]  %s5481_s1, 384, %s44_s26, [#allocation3], %s4982_s23, %s4982_s23, %s4983_s24  }
  0x89   :  { %s4984_s25 = smov [#allocation9]   ;;  %s4985_s7 = smov [#allocation12]  }
  0x8a   :  { %s67_s27 = sshll.u32 %s4984_s25, 4  ;;  %s91_s21 = sshll.u32 %s4985_s7, 4  ;;  %s68_s27 = int_to_ptr.vmem [resolvable:$true] %s67_s27  ;;  %s5189_s21 = int_to_ptr.vmem [resolvable:$true] %s91_s21 }
  0x8b   :  { %s4800_s5 = scalar_lea.hbm %s5484_s4, 1024 }
  0x8c   :  { %p4801_p3 = scmp.ne.s32.totalorder %s5484_s4, %s4800_s5  ;;  %p4804_p4 = scmp.lt.u32.totalorder %s4800_s5, %s5484_s4 }
  0x8e   :  { %p4806_p5 = pnand %p4804_p4, %p4801_p3 }
  0x90   :  { %4809 = shalt.err (!%p4806_p5)
}
  0x91   :  { %s4810_s1 = scalar_lea.vmem %s68_s27, 1024  ;;  %p4815_p7 = scmp.lt.s32.totalorder %s68_s27, %s68_s27 }
  0x92   :  { %p4811_p6 = scmp.ne.s32.totalorder %s68_s27, %s4810_s1  ;;  %p4816_p8 = scmp.lt.s32.totalorder %s4810_s1, %s4810_s1 }
  0x94   :  { %p4817_p9 = por %p4816_p8, %p4815_p7 }
  0x96   :  { %p4818_p10 = pnand %p4817_p9, %p4811_p6 }
  0x98   :  { %4821 = shalt.err (!%p4818_p10)
}
  0x99   :  { %73 = dma.hbm_to_vmem [thread:$0]  %s5484_s4, 1024, %s68_s27, [#allocation8], %s4975_s22, %s4975_s22, %s4976_s30  }
  0x9a   :  { %s4822_s23 = scalar_lea.hbm %s5486_s6, 1024 }
  0x9b   :  { %p4823_p11 = scmp.ne.s32.totalorder %s5486_s6, %s4822_s23  ;;  %p4826_p12 = scmp.lt.u32.totalorder %s4822_s23, %s5486_s6 }
  0x9d   :  { %p4828_p13 = pnand %p4826_p12, %p4823_p11 }
  0x9f   :  { %4831 = shalt.err (!%p4828_p13)
}
  0xa0   :  { %s4832_s7 = scalar_lea.vmem %s5189_s21, 1024  ;;  %p4837_p1 = scmp.lt.s32.totalorder %s5189_s21, %s5189_s21 }
  0xa1   :  { %p4833_p0 = scmp.ne.s32.totalorder %s5189_s21, %s4832_s7  ;;  %p4838_p2 = scmp.lt.s32.totalorder %s4832_s7, %s4832_s7 }
  0xa3   :  { %p4839_p3 = por %p4838_p2, %p4837_p1 }
  0xa5   :  { %p4840_p4 = pnand %p4839_p3, %p4833_p0 }
  0xa7   :  { %4843 = shalt.err (!%p4840_p4)
}
  0xa8   :  { %97 = dma.hbm_to_vmem [thread:$0]  %s5486_s6, 1024, %s5189_s21, [#allocation11], %s4975_s22, %s4975_s22, %s4976_s30  }
  0xa9   :  { %s4986_s28 = smov [#allocation15]   ;;  %s4987_s5 = smov [#allocation18]  }
  0xaa   :  { %s113_s14 = sshll.u32 %s4986_s28, 4  ;;  %s139_s19 = sshll.u32 %s4987_s5, 4  ;;  %s114_s14 = int_to_ptr.vmem [resolvable:$true] %s113_s14  ;;  %s5226_s19 = int_to_ptr.vmem [resolvable:$true] %s139_s19 }
  0xab   :  { %s4844_s12 = scalar_lea.hbm %s5488_s8, 16384 }
  0xac   :  { %p4845_p5 = scmp.ne.s32.totalorder %s5488_s8, %s4844_s12  ;;  %p4848_p6 = scmp.lt.u32.totalorder %s4844_s12, %s5488_s8 }
  0xae   :  { %p4850_p7 = pnand %p4848_p6, %p4845_p5 }
  0xb0   :  { %4853 = shalt.err (!%p4850_p7)
}
  0xb1   :  { %s4854_s6 = scalar_lea.vmem %s114_s14, 16384  ;;  %p4859_p9 = scmp.lt.s32.totalorder %s114_s14, %s114_s14 }
  0xb2   :  { %p4855_p8 = scmp.ne.s32.totalorder %s114_s14, %s4854_s6  ;;  %p4860_p10 = scmp.lt.s32.totalorder %s4854_s6, %s4854_s6 }
  0xb4   :  { %p4861_p11 = por %p4860_p10, %p4859_p9 }
  0xb6   :  { %p4862_p12 = pnand %p4861_p11, %p4855_p8 }
  0xb8   :  { %4865 = shalt.err (!%p4862_p12)
}
  0xb9   :  { %119 = dma.hbm_to_vmem [thread:$0]  %s5488_s8, 16384, %s114_s14, [#allocation14], %s4975_s22, %s4975_s22, %s4976_s30  }
  0xba   :  { %s4866_s10 = scalar_lea.hbm %s5491_s11, 1024 }
  0xbb   :  { %p4867_p13 = scmp.ne.s32.totalorder %s5491_s11, %s4866_s10  ;;  %p4870_p0 = scmp.lt.u32.totalorder %s4866_s10, %s5491_s11 }
  0xbd   :  { %p4872_p1 = pnand %p4870_p0, %p4867_p13 }
  0xbf   :  { %4875 = shalt.err (!%p4872_p1)
}
  0xc0   :  { %s4876_s27 = scalar_lea.vmem %s5226_s19, 1024  ;;  %p4881_p3 = scmp.lt.s32.totalorder %s5226_s19, %s5226_s19 }
  0xc1   :  { %p4877_p2 = scmp.ne.s32.totalorder %s5226_s19, %s4876_s27  ;;  %p4882_p4 = scmp.lt.s32.totalorder %s4876_s27, %s4876_s27 }
  0xc3   :  { %p4883_p5 = por %p4882_p4, %p4881_p3 }
  0xc5   :  { %p4884_p6 = pnand %p4883_p5, %p4877_p2 }
  0xc7   :  { %4887 = shalt.err (!%p4884_p6)
}
  0xc8   :  { %145 = dma.hbm_to_vmem [thread:$0]  %s5491_s11, 1024, %s5226_s19, [#allocation17], %s4975_s22, %s4975_s22, %s4976_s30  }
  0xc9   :  { %s4988_s14 = smov [#allocation21]   ;;  %s4989_s29 = smov [#allocation24]  }
  0xca   :  { %s163_s5 = sshll.u32 %s4988_s14, 4  ;;  %s187_s0 = sshll.u32 %s4989_s29, 4  ;;  %s164_s5 = int_to_ptr.vmem [resolvable:$true] %s163_s5  ;;  %s5263_s0 = int_to_ptr.vmem [resolvable:$true] %s187_s0 }
  0xcb   :  { %s4888_s26 = scalar_lea.hbm %s5493_s13, 1024 }
  0xcc   :  { %p4889_p7 = scmp.ne.s32.totalorder %s5493_s13, %s4888_s26  ;;  %p4892_p8 = scmp.lt.u32.totalorder %s4888_s26, %s5493_s13 }
  0xce   :  { %p4894_p9 = pnand %p4892_p8, %p4889_p7 }
  0xd0   :  { %4897 = shalt.err (!%p4894_p9)
}
  0xd1   :  { %s4898_s11 = scalar_lea.vmem %s164_s5, 1024  ;;  %p4903_p11 = scmp.lt.s32.totalorder %s164_s5, %s164_s5 }
  0xd2   :  { %p4899_p10 = scmp.ne.s32.totalorder %s164_s5, %s4898_s11  ;;  %p4904_p12 = scmp.lt.s32.totalorder %s4898_s11, %s4898_s11 }
  0xd4   :  { %p4905_p13 = por %p4904_p12, %p4903_p11 }
  0xd6   :  { %p4906_p0 = pnand %p4905_p13, %p4899_p10 }
  0xd8   :  { %4909 = shalt.err (!%p4906_p0)
}
  0xd9   :  { %169 = dma.hbm_to_vmem [thread:$0]  %s5493_s13, 1024, %s164_s5, [#allocation20], %s4975_s22, %s4975_s22, %s4976_s30  }
  0xda   :  { %s4910_s10 = scalar_lea.hbm %s5495_s15, 4096 }
  0xdb   :  { %p4911_p1 = scmp.ne.s32.totalorder %s5495_s15, %s4910_s10  ;;  %p4914_p2 = scmp.lt.u32.totalorder %s4910_s10, %s5495_s15 }
  0xdd   :  { %p4916_p3 = pnand %p4914_p2, %p4911_p1 }
  0xdf   :  { %4919 = shalt.err (!%p4916_p3)
}
  0xe0   :  { %s4920_s27 = scalar_lea.vmem %s5263_s0, 4096  ;;  %p4925_p5 = scmp.lt.s32.totalorder %s5263_s0, %s5263_s0 }
  0xe1   :  { %p4921_p4 = scmp.ne.s32.totalorder %s5263_s0, %s4920_s27  ;;  %p4926_p6 = scmp.lt.s32.totalorder %s4920_s27, %s4920_s27 }
  0xe3   :  { %p4927_p7 = por %p4926_p6, %p4925_p5 }
  0xe5   :  { %p4928_p8 = pnand %p4927_p7, %p4921_p4 }
  0xe7   :  { %4931 = shalt.err (!%p4928_p8)
}
  0xe8   :  { %193 = dma.hbm_to_vmem [thread:$0]  %s5495_s15, 4096, %s5263_s0, [#allocation23], %s4975_s22, %s4975_s22, %s4976_s30  }
  0xe9   :  { %4954 = dma.done.wait [#allocation5], 16  }
  0xea   :  { %4955 = vsyncadd [#allocation5], 4294967280 }
  0xeb   :  { %4956 = dma.done.wait [#allocation3], 384  }
  0xec   :  { %4957 = vsyncadd [#allocation3], 4294966912 }
  0xed   :  { %4958 = dma.done.wait [#allocation8], 1152  }
  0xee   :  { %4959 = vsyncadd [#allocation8], 4294966144 }
  0xef   :  { %4960 = dma.done.wait [#allocation11], 2048  }
  0xf0   :  { %4961 = vsyncadd [#allocation11], 4294965248 }
  0xf1   :  { %4962 = dma.done.wait [#allocation14], 17408  }
  0xf2   :  { %4963 = vsyncadd [#allocation14], 4294949888 }
  0xf3   :  { %4964 = dma.done.wait [#allocation17], 2048  }
  0xf4   :  { %4965 = vsyncadd [#allocation17], 4294965248 }
  0xf5   :  { %4966 = dma.done.wait [#allocation20], 2048  }
  0xf6   :  { %4967 = vsyncadd [#allocation20], 4294965248 }
  0xf7   :  { %4968 = dma.done.wait [#allocation23], 7168  }
  0xf8   :  { %4969 = vsyncadd [#allocation23], 4294960128 }
  0xf9   :  { %236 = sfence }
  0xfa   :  { %v4348_v0 = vld [vmem:[#allocation9] sm:$0xff]   ;;  %v4990_v1 = vmov 0.0   ;;  %v4349_v2 = vld [vmem:[#allocation9 + $0x8] sm:$0xff]   ;;  %vm4991_vm0 = vmmov 0   ;;  %v4350_v3 = vld [vmem:[#allocation9 + $0x10] sm:$0xff]   ;;  %vm350_vm1 = vcmask 64512  }
  0xfb   :  { %4112 = vmatprep.subr.bf16.mxu0 %v4990_v1  ;;  %4132 = vmatprep.subr.mxu1 %v4990_v1  ;;  %v4351_v4 = vld [vmem:[#allocation9 + $0x18] sm:$0xff]   ;;  %v4352_v5 = vld [vmem:[#allocation9 + $0x20] sm:$0xff]   ;;  %v4353_v6 = vld [vmem:[#allocation9 + $0x28] sm:$0xff]   ;;  %s4992_s28 = smov 0.1   ;;  %s4993_s5 = smov 10.0  }
  0xfc   :  { %4113 = vmatpush3.bf16.msra.mxu0 %v4348_v0  ;;  %4128 = vmatprep.mubr.msk.bf16.mxu0 %vm4991_vm0, %v4990_v1  ;;  %v4354_v7 = vld [vmem:[#allocation9 + $0x30] sm:$0xff]   ;;  %v4355_v8 = vld [vmem:[#allocation9 + $0x38] sm:$0xff]   ;;  %v4356_v12 = vld [vmem:[#allocation10] sm:$0xff]   ;;  %s3724_s0 = sld [smem:[#allocation2 + $0x4]]  ;;  %s3735_s1 = sld [smem:[#allocation2 + $0x5]]  ;;  %vm3475_vm2 = vcmask 7168  }
  0xfd   :  { %4114 = vmatprep.subr.bf16.mxu0 %v4990_v1  ;;  %4134 = vmatprep.mubr.msk.f32.mxu1 %vm4991_vm0, %v4990_v1  ;;  %v239_v9 = vld [vmem:[%s5483_s3] sm:$0xff]  ;;  %v5322_v11 = vld [vmem:[#allocation7] sm:$0xff]  ;;  %v4357_v17 = vld [vmem:[#allocation10 + $0x8] sm:$0xff]   ;;  %s3759_s26 = sld [smem:[#allocation2 + $0x7]]  ;;  %s3747_s17 = sld [smem:[#allocation2 + $0x6]]  ;;  %vm3477_vm3 = vcmask 15360  }
  0xfe   :  { %v5316_v10 = vpack.c.bf16 %v239_v9, %v239_v9  ;;  %v4358_v18 = vld [vmem:[#allocation10 + $0x10] sm:$0xff]   ;;  %v4359_v19 = vld [vmem:[#allocation10 + $0x18] sm:$0xff]   ;;  %v4360_v20 = vld [vmem:[#allocation10 + $0x20] sm:$0xff]   ;;  %s3761_s18 = sld [smem:[#allocation2 + $0x1]]  ;;  %s3762_s6 = sld [smem:[#allocation2 + $0x2]]  ;;  %vm3483_vm4 = vcmask 154752  }
  0xff   :  { %v4361_v21 = vld [vmem:[#allocation10 + $0x28] sm:$0xff]   ;;  %v4362_v22 = vld [vmem:[#allocation10 + $0x30] sm:$0xff]   ;;  %v4363_v23 = vld [vmem:[#allocation10 + $0x38] sm:$0xff]   ;;  %s3763_s21 = sld [smem:[#allocation2 + $0x3]]  ;;  %s4994_s23 = smov 16  }
 0x100   :  { %4115 = vmatpush3.bf16.msra.mxu0 %v4349_v2  ;;  %v3515_v24 = vld [vmem:[#allocation6] ss:$0 sm:$0xff]  ;;  %v4365_v31 = vld [vmem:[#allocation12 + $0x8] sm:$0xff]   ;;  %v4366_v32 = vld [vmem:[#allocation12 + $0x10] sm:$0xff]   ;;  %s4995_s24 = smov [#allocation25]  }
 0x101   :  { %4116 = vmatprep.subr.bf16.mxu0 %v4990_v1  ;;  %v4364_v29 = vld [vmem:[#allocation12] sm:$0xff]   ;;  %v4367_v33 = vld [vmem:[#allocation12 + $0x18] sm:$0xff]   ;;  %v4369_v35 = vld [vmem:[#allocation12 + $0x28] sm:$0xff]   ;;  %s3491_s10 = sshll.u32 %s4995_s24, 4  ;;  %s3492_s10 = int_to_ptr.vmem [resolvable:$true] %s3491_s10 }
 0x102   :  { %v4368_v34 = vld [vmem:[#allocation12 + $0x20] sm:$0xff]   ;;  %v4370_v36 = vld [vmem:[#allocation12 + $0x30] sm:$0xff]   ;;  %v4371_v37 = vld [vmem:[#allocation12 + $0x38] sm:$0xff]   ;;  %s4932_s2 = scalar_lea.vmem %s3492_s10, 128  ;;  %p4937_p10 = scmp.lt.s32.totalorder %s3492_s10, %s3492_s10 }
 0x103   :  { %v4374_v38 = vld [vmem:[#allocation15 + $0xc0] sm:$0xff]   ;;  %v4378_v40 = vld [vmem:[#allocation15 + $0xc8] sm:$0xff]   ;;  %v4382_v42 = vld [vmem:[#allocation15 + $0xd0] sm:$0xff]   ;;  %p4933_p9 = scmp.ne.s32.totalorder %s3492_s10, %s4932_s2  ;;  %p4938_p11 = scmp.lt.s32.totalorder %s4932_s2, %s4932_s2 }
 0x104   :  { %4117 = vmatpush3.bf16.msra.mxu0 %v4350_v3  ;;  %v4375_v39 = vld [vmem:[#allocation15 + $0x80] sm:$0xff]   ;;  %v4379_v41 = vld [vmem:[#allocation15 + $0x88] sm:$0xff]   ;;  %v4383_v43 = vld [vmem:[#allocation15 + $0x90] sm:$0xff]   ;;  %s3103_s11 = smul.f32 0.1, %s3761_s18 }
 0x105   :  { %4118 = vmatprep.subr.bf16.mxu0 %v4990_v1  ;;  %v4386_v44 = vld [vmem:[#allocation15 + $0xd8] sm:$0xff]   ;;  %v4390_v46 = vld [vmem:[#allocation15 + $0xe0] sm:$0xff]   ;;  %v4394_v48 = vld [vmem:[#allocation15 + $0xe8] sm:$0xff]   ;;  %s3110_s19 = smul.f32 0.1, %s3762_s6  ;;  %p4939_p12 = por %p4938_p11, %p4937_p10 }
 0x106   :  { %v4387_v45 = vld [vmem:[#allocation15 + $0x98] sm:$0xff]   ;;  %v4391_v47 = vld [vmem:[#allocation15 + $0xa0] sm:$0xff]   ;;  %v4395_v49 = vld [vmem:[#allocation15 + $0xa8] sm:$0xff]   ;;  %s3117_s20 = smul.f32 0.1, %s3763_s21 }
 0x107   :  { %v4398_v50 = vld [vmem:[#allocation15 + $0xf0] sm:$0xff]   ;;  %v4402_v52 = vld [vmem:[#allocation15 + $0xf8] sm:$0xff]   ;;  %v718_v54 = vld [vmem:[#allocation13 + $0x8] sm:$0xff]  ;;  %p4940_p13 = pnand %p4939_p12, %p4933_p9 }
 0x108   :  { %4119 = vmatpush3.bf16.msra.mxu0 %v4351_v4  ;;  %v4399_v51 = vld [vmem:[#allocation15 + $0xb0] sm:$0xff]   ;;  %v4403_v53 = vld [vmem:[#allocation15 + $0xb8] sm:$0xff]   ;;  %v3540_v55 = vcombine.high %v718_v54, %v718_v54  ;;  %v4410_v56 = vld [vmem:[#allocation15 + $0x1c0] sm:$0xff]   ;;  %v3539_v57 = vcombine.low %v718_v54, %v718_v54 }
 0x109   :  { %4120 = vmatprep.subr.bf16.mxu0 %v4990_v1  ;;  %v4411_v58 = vld [vmem:[#allocation15 + $0x180] sm:$0xff]   ;;  %v4414_v59 = vld [vmem:[#allocation15 + $0x1c8] sm:$0xff]   ;;  %v4418_v61 = vld [vmem:[#allocation15 + $0x1d0] sm:$0xff]  }
 0x10a   :  { %v4415_v60 = vld [vmem:[#allocation15 + $0x188] sm:$0xff]   ;;  %v4419_v62 = vld [vmem:[#allocation15 + $0x190] sm:$0xff]   ;;  %v4422_v63 = vld [vmem:[#allocation15 + $0x1d8] sm:$0xff]  }
 0x10b   :  { %v4423_v0 = vld [vmem:[#allocation15 + $0x198] sm:$0xff]   ;;  %v4426_v2 = vld [vmem:[#allocation15 + $0x1e0] sm:$0xff]   ;;  %v4430_v4 = vld [vmem:[#allocation15 + $0x1e8] sm:$0xff]  }
 0x10c   :  { %4121 = vmatpush3.bf16.msra.mxu0 %v4352_v5  ;;  %v4427_v3 = vld [vmem:[#allocation15 + $0x1a0] sm:$0xff]   ;;  %v4431_v5 = vld [vmem:[#allocation15 + $0x1a8] sm:$0xff]   ;;  %v4441_v9 = vld [vmem:[#allocation15 + $0x1b8] sm:$0xff]  }
 0x10d   :  { %4122 = vmatprep.subr.bf16.mxu0 %v4990_v1 }
 0x110   :  { %4123 = vmatpush3.bf16.msra.mxu0 %v4353_v6  ;;  %v4434_v6 = vld [vmem:[#allocation15 + $0x1f0] sm:$0xff]  }
 0x111   :  { %4124 = vmatprep.subr.bf16.mxu0 %v4990_v1 }
 0x114   :  { %4125 = vmatpush3.bf16.msra.mxu0 %v4354_v7  ;;  %v4435_v7 = vld [vmem:[#allocation15 + $0x1b0] sm:$0xff]  }
 0x115   :  { %4126 = vmatprep.subr.bf16.mxu0 %v4990_v1 }
 0x118   :  { %4127 = vmatpush3.bf16.msra.mxu0 %v4355_v8  ;;  %v4438_v8 = vld [vmem:[#allocation15 + $0x1f8] sm:$0xff]  }
 0x119   :  { %4157 = vmatprep.subr.mxu0 %v4990_v1 }
 0x11b   :  { %4129 = vmatmul.mubr.bf16.vlgmr.msra.gmra.mrb[0].mxu0 %v5316_v10 }
 0x11c   :  { %4159 = vmatprep.mubr.msk.f32.mxu0 %vm4991_vm0, %v4990_v1 }
 0x1ee   :  { %v339_v13 = vpop.f32.mrb[0].mxu0 }
 0x1ef   :  { %v4130_v14 = vpop.f32.mrb[1].mxu0  ;;  %4133 = vmatpush3.msra.mxu1 %v339_v13  ;;  %v4446_v13 = vld [vmem:[#allocation15 + $0x2c0] sm:$0xff]  }
 0x1f0   :  { %v342_v15 = vpop.f32.mrb[2].mxu0  ;;  %4135 = vmatmul.mubr.msk.f32.vlgmr.msra.gmra.mrb[0].mxu1 %vm350_vm1, %v5322_v11  ;;  %4137 = vmatprep.subr.bf16.mxu1 %v4990_v1 }
 0x1f1   :  { %v4131_v16 = vpop.f32.mrb[3].mxu0  ;;  %4138 = vmatpush3.bf16.msra.mxu1 %v4356_v12  ;;  %4153 = vmatprep.mubr.msk.bf16.mxu1 %vm4991_vm0, %v4990_v1  ;;  %v4447_v15 = vld [vmem:[#allocation15 + $0x280] sm:$0xff]  }
 0x1f2   :  { %4139 = vmatprep.subr.bf16.mxu1 %v4990_v1  ;;  %v4450_v16 = vld [vmem:[#allocation15 + $0x2c8] sm:$0xff]  }
 0x1f5   :  { %4140 = vmatpush3.bf16.msra.mxu1 %v4357_v17  ;;  %v4451_v17 = vld [vmem:[#allocation15 + $0x288] sm:$0xff]  }
 0x1f6   :  { %4141 = vmatprep.subr.bf16.mxu1 %v4990_v1 }
 0x1f9   :  { %4142 = vmatpush3.bf16.msra.mxu1 %v4358_v18  ;;  %v4454_v18 = vld [vmem:[#allocation15 + $0x2d0] sm:$0xff]  }
 0x1fa   :  { %4143 = vmatprep.subr.bf16.mxu1 %v4990_v1 }
 0x1fd   :  { %4144 = vmatpush3.bf16.msra.mxu1 %v4359_v19  ;;  %v4455_v19 = vld [vmem:[#allocation15 + $0x290] sm:$0xff]  }
 0x1fe   :  { %4145 = vmatprep.subr.bf16.mxu1 %v4990_v1 }
 0x201   :  { %4146 = vmatpush3.bf16.msra.mxu1 %v4360_v20  ;;  %v4458_v20 = vld [vmem:[#allocation15 + $0x2d8] sm:$0xff]  }
 0x202   :  { %4147 = vmatprep.subr.bf16.mxu1 %v4990_v1 }
 0x205   :  { %4148 = vmatpush3.bf16.msra.mxu1 %v4361_v21  ;;  %v4459_v21 = vld [vmem:[#allocation15 + $0x298] sm:$0xff]  }
 0x206   :  { %4149 = vmatprep.subr.bf16.mxu1 %v4990_v1 }
 0x209   :  { %4150 = vmatpush3.bf16.msra.mxu1 %v4362_v22  ;;  %v4462_v22 = vld [vmem:[#allocation15 + $0x2e0] sm:$0xff]  }
 0x20a   :  { %4151 = vmatprep.subr.bf16.mxu1 %v4990_v1 }
 0x20d   :  { %4152 = vmatpush3.bf16.msra.mxu1 %v4363_v23  ;;  %v4463_v23 = vld [vmem:[#allocation15 + $0x2a0] sm:$0xff]  }
 0x20e   :  { %4162 = vmatprep.subr.bf16.mxu1 %v4990_v1 }
 0x2c3   :  { %v420_v25 = vpop.f32.mrb[0].mxu1 }
 0x2c4   :  { %v421_v26 = vadd.f32 %v3515_v24, %v420_v25  ;;  %v4136_v27 = vpop.f32.mrb[1].mxu1  ;;  %v4466_v24 = vld [vmem:[#allocation15 + $0x2e8] sm:$0xff]  }
 0x2c5   :  { %v4467_v25 = vld [vmem:[#allocation15 + $0x2a8] sm:$0xff]   ;;  %v4471_v27 = vld [vmem:[#allocation15 + $0x2b0] sm:$0xff]  }
 0x2c6   :  { %v424_v28 = vmax.f32 %v421_v26, 0.0  ;;  %v4470_v26 = vld [vmem:[#allocation15 + $0x2f0] sm:$0xff]  }
 0x2c8   :  { %v425_v30 = vpack.c.bf16 %v424_v28, %v424_v28  ;;  %v4474_v28 = vld [vmem:[#allocation15 + $0x2f8] sm:$0xff]  }
 0x2ca   :  { %4154 = vmatmul.mubr.bf16.vlgmr.msra.gmra.mrb[4].mxu1 %v425_v30  ;;  %v722_v30 = vld [vmem:[#allocation13 + $0x28] sm:$0xff] }
 0x2cb   :  { %4163 = vmatpush3.bf16.msra.mxu1 %v4364_v29  ;;  %4178 = vmatprep.mubr.msk.bf16.mxu1 %vm4991_vm0, %v4990_v1  ;;  %v4477_v29 = vld [vmem:[#allocation15 + $0x2b8] sm:$0xff]  }
 0x2cc   :  { %4164 = vmatprep.subr.bf16.mxu1 %v4990_v1 }
 0x2cf   :  { %4165 = vmatpush3.bf16.msra.mxu1 %v4365_v31  ;;  %v3548_v31 = vcombine.high %v722_v30, %v722_v30 }
 0x2d0   :  { %4166 = vmatprep.subr.bf16.mxu1 %v4990_v1 }
 0x2d3   :  { %4167 = vmatpush3.bf16.msra.mxu1 %v4366_v32  ;;  %v4482_v32 = vld [vmem:[#allocation15 + $0x3c0] sm:$0xff]  }
 0x2d4   :  { %4168 = vmatprep.subr.bf16.mxu1 %v4990_v1 }
 0x2d7   :  { %4169 = vmatpush3.bf16.msra.mxu1 %v4367_v33  ;;  %v3547_v33 = vcombine.low %v722_v30, %v722_v30  ;;  %v4442_v30 = vld [vmem:[#allocation15 + $0x240] sm:$0xff]  }
 0x2d8   :  { %4170 = vmatprep.subr.bf16.mxu1 %v4990_v1 }
 0x2db   :  { %4171 = vmatpush3.bf16.msra.mxu1 %v4368_v34  ;;  %v4483_v34 = vld [vmem:[#allocation15 + $0x380] sm:$0xff]  }
 0x2dc   :  { %4172 = vmatprep.subr.bf16.mxu1 %v4990_v1 }
 0x2df   :  { %4173 = vmatpush3.bf16.msra.mxu1 %v4369_v35  ;;  %v4486_v35 = vld [vmem:[#allocation15 + $0x3c8] sm:$0xff]  }
 0x2e0   :  { %4174 = vmatprep.subr.bf16.mxu1 %v4990_v1 }
 0x2e3   :  { %4175 = vmatpush3.bf16.msra.mxu1 %v4370_v36  ;;  %v4487_v36 = vld [vmem:[#allocation15 + $0x388] sm:$0xff]  }
 0x2e4   :  { %4176 = vmatprep.subr.bf16.mxu1 %v4990_v1 }
 0x2e7   :  { %4177 = vmatpush3.bf16.msra.mxu1 %v4371_v37  ;;  %v4490_v37 = vld [vmem:[#allocation15 + $0x3d0] sm:$0xff]  }
 0x2e8   :  { %3850 = vmatprep.subr.bf16.mxu1 %v4374_v38  ;;  %v4491_v38 = vld [vmem:[#allocation15 + $0x390] sm:$0xff]  }
 0x2ea   :  { %4179 = vmatmul.mubr.bf16.vlgmr.msra.gmra.mrb[8].mxu1 %v5316_v10  ;;  %v720_v10 = vld [vmem:[#allocation13 + $0x18] sm:$0xff] }
 0x2eb   :  { %3851 = vmatpush3.bf16.msra.mxu1 %v4375_v39  ;;  %1882 = vmatprep.mubr.bf16.mxu1 %v3540_v55  ;;  %v3544_v12 = vcombine.high %v720_v10, %v720_v10  ;;  %v3543_v14 = vcombine.low %v720_v10, %v720_v10  ;;  %v4494_v39 = vld [vmem:[#allocation15 + $0x3d8] sm:$0xff]   ;;  %v4406_v10 = vld [vmem:[#allocation15 + $0x140] sm:$0xff]  }
 0x2ec   :  { %3852 = vmatprep.subr.bf16.mxu1 %v4378_v40  ;;  %v4495_v40 = vld [vmem:[#allocation15 + $0x398] sm:$0xff]  }
 0x2ef   :  { %3853 = vmatpush3.bf16.msra.mxu1 %v4379_v41  ;;  %v4498_v41 = vld [vmem:[#allocation15 + $0x3e0] sm:$0xff]  }
 0x2f0   :  { %3854 = vmatprep.subr.bf16.mxu1 %v4382_v42  ;;  %v4499_v42 = vld [vmem:[#allocation15 + $0x3a0] sm:$0xff]  }
 0x2f3   :  { %3855 = vmatpush3.bf16.msra.mxu1 %v4383_v43  ;;  %v4502_v43 = vld [vmem:[#allocation15 + $0x3e8] sm:$0xff]  }
 0x2f4   :  { %3856 = vmatprep.subr.bf16.mxu1 %v4386_v44  ;;  %v4503_v44 = vld [vmem:[#allocation15 + $0x3a8] sm:$0xff]  }
 0x2f7   :  { %3857 = vmatpush3.bf16.msra.mxu1 %v4387_v45  ;;  %v4506_v45 = vld [vmem:[#allocation15 + $0x3f0] sm:$0xff]  }
 0x2f8   :  { %3858 = vmatprep.subr.bf16.mxu1 %v4390_v46  ;;  %v4507_v46 = vld [vmem:[#allocation15 + $0x3b0] sm:$0xff]  }
 0x2fb   :  { %3859 = vmatpush3.bf16.msra.mxu1 %v4391_v47  ;;  %v4510_v47 = vld [vmem:[#allocation15 + $0x3f8] sm:$0xff]  }
 0x2fc   :  { %3860 = vmatprep.subr.bf16.mxu1 %v4394_v48  ;;  %v717_v48 = vld [vmem:[#allocation13] sm:$0xff] }
 0x2fd   :  { %v3538_v54 = vcombine.high %v717_v48, %v717_v48 }
 0x2ff   :  { %3861 = vmatpush3.bf16.msra.mxu1 %v4395_v49  ;;  %v4513_v49 = vld [vmem:[#allocation15 + $0x3b8] sm:$0xff]  }
 0x300   :  { %3862 = vmatprep.subr.bf16.mxu1 %v4398_v50  ;;  %v724_v50 = vld [vmem:[#allocation13 + $0x38] sm:$0xff] }
 0x303   :  { %3863 = vmatpush3.bf16.msra.mxu1 %v4399_v51  ;;  %v4372_v51 = vld [vmem:[#allocation15 + $0x40] sm:$0xff]  }
 0x304   :  { %3864 = vmatprep.subr.bf16.mxu1 %v4402_v52  ;;  %v3552_v52 = vcombine.high %v724_v50, %v724_v50 }
 0x307   :  { %3865 = vmatpush3.bf16.msra.mxu1 %v4403_v53  ;;  %v4373_v53 = vld [vmem:[#allocation15] sm:$0xff]  }
 0x308   :  { %3894 = vmatprep.subr.bf16.mxu1 %v4410_v56  ;;  %v4376_v56 = vld [vmem:[#allocation15 + $0x48] sm:$0xff]  }
 0x30a   :  { %1883 = vmatmul.mubr.bf16.vlgmr.msra.gmra.mrb[12].mxu1 %v3539_v57  ;;  %v3551_v57 = vcombine.low %v724_v50, %v724_v50  ;;  %v4472_v50 = vld [vmem:[#allocation15 + $0x278] sm:$0xff]  }
 0x30b   :  { %3895 = vmatpush3.bf16.msra.mxu1 %v4411_v58  ;;  %1962 = vmatprep.mubr.bf16.mxu1 %v3544_v12  ;;  %v719_v12 = vld [vmem:[#allocation13 + $0x10] sm:$0xff] }
 0x30c   :  { %3896 = vmatprep.subr.bf16.mxu1 %v4414_v59 }
 0x30f   :  { %3897 = vmatpush3.bf16.msra.mxu1 %v4415_v60 }
 0x310   :  { %3898 = vmatprep.subr.bf16.mxu1 %v4418_v61  ;;  %v4377_v61 = vld [vmem:[#allocation15 + $0x8] sm:$0xff]  }
 0x313   :  { %3899 = vmatpush3.bf16.msra.mxu1 %v4419_v62  ;;  %v4380_v62 = vld [vmem:[#allocation15 + $0x50] sm:$0xff]  }
 0x314   :  { %3900 = vmatprep.subr.bf16.mxu1 %v4422_v63  ;;  %v4381_v63 = vld [vmem:[#allocation15 + $0x10] sm:$0xff]  }
 0x317   :  { %3901 = vmatpush3.bf16.msra.mxu1 %v4423_v0  ;;  %v4384_v0 = vld [vmem:[#allocation15 + $0x58] sm:$0xff]  }
 0x318   :  { %3902 = vmatprep.subr.bf16.mxu1 %v4426_v2  ;;  %v4385_v2 = vld [vmem:[#allocation15 + $0x18] sm:$0xff]  }
 0x31b   :  { %3903 = vmatpush3.bf16.msra.mxu1 %v4427_v3  ;;  %v4388_v3 = vld [vmem:[#allocation15 + $0x60] sm:$0xff]  }
 0x31c   :  { %3904 = vmatprep.subr.bf16.mxu1 %v4430_v4  ;;  %v4392_v4 = vld [vmem:[#allocation15 + $0x68] sm:$0xff]  }
 0x31f   :  { %3905 = vmatpush3.bf16.msra.mxu1 %v4431_v5  ;;  %v4393_v5 = vld [vmem:[#allocation15 + $0x28] sm:$0xff]  }
 0x320   :  { %3906 = vmatprep.subr.bf16.mxu1 %v4434_v6  ;;  %v4396_v6 = vld [vmem:[#allocation15 + $0x70] sm:$0xff]  }
 0x323   :  { %3907 = vmatpush3.bf16.msra.mxu1 %v4435_v7  ;;  %v4397_v7 = vld [vmem:[#allocation15 + $0x30] sm:$0xff]  }
 0x324   :  { %3908 = vmatprep.subr.bf16.mxu1 %v4438_v8  ;;  %v4400_v8 = vld [vmem:[#allocation15 + $0x78] sm:$0xff]  }
 0x327   :  { %3909 = vmatpush3.bf16.msra.mxu1 %v4441_v9  ;;  %v4401_v9 = vld [vmem:[#allocation15 + $0x38] sm:$0xff]  }
 0x328   :  { %3938 = vmatprep.subr.bf16.mxu1 %v4446_v13  ;;  %v3537_v13 = vcombine.low %v717_v48, %v717_v48  ;;  %v4469_v48 = vld [vmem:[#allocation15 + $0x230] sm:$0xff]  }
 0x32a   :  { %1963 = vmatmul.mubr.bf16.vlgmr.msra.gmra.mrb[16].mxu1 %v3543_v14  ;;  %v4407_v14 = vld [vmem:[#allocation15 + $0x100] sm:$0xff]  }
 0x32b   :  { %3939 = vmatpush3.bf16.msra.mxu1 %v4447_v15  ;;  %2042 = vmatprep.mubr.bf16.mxu1 %v3548_v31  ;;  %v3542_v15 = vcombine.high %v719_v12, %v719_v12  ;;  %v721_v31 = vld [vmem:[#allocation13 + $0x20] sm:$0xff] }
 0x32c   :  { %3940 = vmatprep.subr.bf16.mxu1 %v4450_v16  ;;  %v4412_v16 = vld [vmem:[#allocation15 + $0x148] sm:$0xff]  }
 0x32f   :  { %3941 = vmatpush3.bf16.msra.mxu1 %v4451_v17  ;;  %v4413_v17 = vld [vmem:[#allocation15 + $0x108] sm:$0xff]  }
 0x330   :  { %3942 = vmatprep.subr.bf16.mxu1 %v4454_v18  ;;  %v4416_v18 = vld [vmem:[#allocation15 + $0x150] sm:$0xff]  }
 0x333   :  { %3943 = vmatpush3.bf16.msra.mxu1 %v4455_v19  ;;  %v4417_v19 = vld [vmem:[#allocation15 + $0x110] sm:$0xff]  }
 0x334   :  { %3944 = vmatprep.subr.bf16.mxu1 %v4458_v20  ;;  %v4420_v20 = vld [vmem:[#allocation15 + $0x158] sm:$0xff]  }
 0x337   :  { %3945 = vmatpush3.bf16.msra.mxu1 %v4459_v21  ;;  %v4421_v21 = vld [vmem:[#allocation15 + $0x118] sm:$0xff]  }
 0x338   :  { %3946 = vmatprep.subr.bf16.mxu1 %v4462_v22  ;;  %v4424_v22 = vld [vmem:[#allocation15 + $0x160] sm:$0xff]  }
 0x33b   :  { %3947 = vmatpush3.bf16.msra.mxu1 %v4463_v23  ;;  %v4425_v23 = vld [vmem:[#allocation15 + $0x120] sm:$0xff]  }
 0x33c   :  { %3948 = vmatprep.subr.bf16.mxu1 %v4466_v24  ;;  %v4428_v24 = vld [vmem:[#allocation15 + $0x168] sm:$0xff]  }
 0x33f   :  { %3949 = vmatpush3.bf16.msra.mxu1 %v4467_v25  ;;  %v4429_v25 = vld [vmem:[#allocation15 + $0x128] sm:$0xff]  }
 0x340   :  { %3950 = vmatprep.subr.bf16.mxu1 %v4470_v26  ;;  %v4432_v26 = vld [vmem:[#allocation15 + $0x170] sm:$0xff]  }
 0x343   :  { %3951 = vmatpush3.bf16.msra.mxu1 %v4471_v27  ;;  %v4433_v27 = vld [vmem:[#allocation15 + $0x130] sm:$0xff]  }
 0x344   :  { %3952 = vmatprep.subr.bf16.mxu1 %v4474_v28  ;;  %v4436_v28 = vld [vmem:[#allocation15 + $0x178] sm:$0xff]  }
 0x347   :  { %3953 = vmatpush3.bf16.msra.mxu1 %v4477_v29  ;;  %v4437_v29 = vld [vmem:[#allocation15 + $0x138] sm:$0xff]  }
 0x348   :  { %3982 = vmatprep.subr.bf16.mxu1 %v4482_v32  ;;  %v3541_v32 = vcombine.low %v719_v12, %v719_v12 }
 0x34a   :  { %2043 = vmatmul.mubr.bf16.vlgmr.msra.gmra.mrb[20].mxu1 %v3547_v33  ;;  %v4445_v33 = vld [vmem:[#allocation15 + $0x200] sm:$0xff]  }
 0x34b   :  { %3983 = vmatpush3.bf16.msra.mxu1 %v4483_v34  ;;  %2122 = vmatprep.mubr.bf16.mxu1 %v3552_v52  ;;  %v3546_v34 = vcombine.high %v721_v31, %v721_v31  ;;  %v4473_v52 = vld [vmem:[#allocation15 + $0x238] sm:$0xff]  }
 0x34c   :  { %3984 = vmatprep.subr.bf16.mxu1 %v4486_v35  ;;  %v4448_v35 = vld [vmem:[#allocation15 + $0x248] sm:$0xff]  }
 0x34f   :  { %3985 = vmatpush3.bf16.msra.mxu1 %v4487_v36  ;;  %v4449_v36 = vld [vmem:[#allocation15 + $0x208] sm:$0xff]  }
 0x350   :  { %3986 = vmatprep.subr.bf16.mxu1 %v4490_v37  ;;  %v4452_v37 = vld [vmem:[#allocation15 + $0x250] sm:$0xff]  }
 0x353   :  { %3987 = vmatpush3.bf16.msra.mxu1 %v4491_v38  ;;  %v4453_v38 = vld [vmem:[#allocation15 + $0x210] sm:$0xff]  }
 0x354   :  { %3988 = vmatprep.subr.bf16.mxu1 %v4494_v39  ;;  %v4456_v39 = vld [vmem:[#allocation15 + $0x258] sm:$0xff]  }
 0x357   :  { %3989 = vmatpush3.bf16.msra.mxu1 %v4495_v40  ;;  %v4457_v40 = vld [vmem:[#allocation15 + $0x218] sm:$0xff]  }
 0x358   :  { %3990 = vmatprep.subr.bf16.mxu1 %v4498_v41  ;;  %v4460_v41 = vld [vmem:[#allocation15 + $0x260] sm:$0xff]  }
 0x35b   :  { %3991 = vmatpush3.bf16.msra.mxu1 %v4499_v42  ;;  %v4461_v42 = vld [vmem:[#allocation15 + $0x220] sm:$0xff]  }
 0x35c   :  { %3992 = vmatprep.subr.bf16.mxu1 %v4502_v43  ;;  %v4464_v43 = vld [vmem:[#allocation15 + $0x268] sm:$0xff]  }
 0x35f   :  { %3993 = vmatpush3.bf16.msra.mxu1 %v4503_v44  ;;  %v4465_v44 = vld [vmem:[#allocation15 + $0x228] sm:$0xff]  }
 0x360   :  { %3994 = vmatprep.subr.bf16.mxu1 %v4506_v45  ;;  %v4468_v45 = vld [vmem:[#allocation15 + $0x270] sm:$0xff]  }
 0x363   :  { %3995 = vmatpush3.bf16.msra.mxu1 %v4507_v46 }
 0x364   :  { %3996 = vmatprep.subr.bf16.mxu1 %v4510_v47 }
 0x367   :  { %3997 = vmatpush3.bf16.msra.mxu1 %v4513_v49 }
 0x368   :  { %4202 = vmatprep.subr.bf16.mxu1 %v4990_v1 }
 0x36a   :  { %2123 = vmatmul.mubr.bf16.vlgmr.msra.gmra.mrb[24].mxu1 %v3551_v57 }
 0x36b   :  { %4218 = vmatprep.mubr.msk.bf16.mxu1 %vm4991_vm0, %v4990_v1 }
 0x39d   :  { %v524_v55 = vpop.f32.mrb[4].mxu1 }
 0x39e   :  { %v4155_v58 = vpop.f32.mrb[5].mxu1  ;;  %4158 = vmatpush3.msra.mxu0 %v524_v55  ;;  %v3545_v55 = vcombine.low %v721_v31, %v721_v31  ;;  %v4525_v31 = vld [vmem:[#allocation19 + $0x8] sm:$0xff]  }
 0x39f   :  { %v527_v59 = vpop.f32.mrb[6].mxu1  ;;  %4160 = vmatmul.mubr.msk.f32.vlgmr.msra.gmra.mrb[4].mxu0 %vm350_vm1, %v5322_v11  ;;  %3828 = vmatprep.subr.bf16.mxu0 %v4372_v51  ;;  %v4389_v11 = vld [vmem:[#allocation15 + $0x20] sm:$0xff]   ;;  %v4484_v58 = vld [vmem:[#allocation15 + $0x348] sm:$0xff]  }
 0x3a0   :  { %v4156_v60 = vpop.f32.mrb[7].mxu1  ;;  %3829 = vmatpush3.bf16.msra.mxu0 %v4373_v53  ;;  %1842 = vmatprep.mubr.bf16.mxu0 %v3538_v54  ;;  %v4478_v53 = vld [vmem:[#allocation15 + $0x340] sm:$0xff]   ;;  %v723_v54 = vld [vmem:[#allocation13 + $0x30] sm:$0xff]  ;;  %v4485_v59 = vld [vmem:[#allocation15 + $0x308] sm:$0xff]  }
 0x3a1   :  { %3830 = vmatprep.subr.bf16.mxu0 %v4376_v56  ;;  %v4481_v56 = vld [vmem:[#allocation15 + $0x300] sm:$0xff]   ;;  %v3550_v57 = vcombine.high %v723_v54, %v723_v54  ;;  %v4488_v60 = vld [vmem:[#allocation15 + $0x350] sm:$0xff]  }
 0x3a4   :  { %3831 = vmatpush3.bf16.msra.mxu0 %v4377_v61  ;;  %v4489_v61 = vld [vmem:[#allocation15 + $0x310] sm:$0xff]  }
 0x3a5   :  { %3832 = vmatprep.subr.bf16.mxu0 %v4380_v62  ;;  %v4492_v62 = vld [vmem:[#allocation15 + $0x358] sm:$0xff]  }
 0x3a8   :  { %3833 = vmatpush3.bf16.msra.mxu0 %v4381_v63  ;;  %v4493_v63 = vld [vmem:[#allocation15 + $0x318] sm:$0xff]  }
 0x3a9   :  { %3834 = vmatprep.subr.bf16.mxu0 %v4384_v0  ;;  %v4496_v0 = vld [vmem:[#allocation15 + $0x360] sm:$0xff]  }
 0x3ac   :  { %3835 = vmatpush3.bf16.msra.mxu0 %v4385_v2  ;;  %v4497_v2 = vld [vmem:[#allocation15 + $0x320] sm:$0xff]  }
 0x3ad   :  { %3836 = vmatprep.subr.bf16.mxu0 %v4388_v3  ;;  %v4500_v3 = vld [vmem:[#allocation15 + $0x368] sm:$0xff]  }
 0x3b0   :  { %3837 = vmatpush3.bf16.msra.mxu0 %v4389_v11  ;;  %v4501_v11 = vld [vmem:[#allocation15 + $0x328] sm:$0xff]  }
 0x3b1   :  { %3838 = vmatprep.subr.bf16.mxu0 %v4392_v4  ;;  %v4504_v4 = vld [vmem:[#allocation15 + $0x370] sm:$0xff]  }
 0x3b4   :  { %3839 = vmatpush3.bf16.msra.mxu0 %v4393_v5 }
 0x3b5   :  { %3840 = vmatprep.subr.bf16.mxu0 %v4396_v6 }
 0x3b8   :  { %3841 = vmatpush3.bf16.msra.mxu0 %v4397_v7  ;;  %v4505_v7 = vld [vmem:[#allocation15 + $0x330] sm:$0xff]  }
 0x3b9   :  { %3842 = vmatprep.subr.bf16.mxu0 %v4400_v8 }
 0x3bc   :  { %3843 = vmatpush3.bf16.msra.mxu0 %v4401_v9  ;;  %v4508_v9 = vld [vmem:[#allocation15 + $0x378] sm:$0xff]  }
 0x3bd   :  { %3872 = vmatprep.subr.bf16.mxu0 %v4406_v10  ;;  %v5352_v46 = vpop.f32.mrb[8].mxu1 }
 0x3be   :  { %v4180_v47 = vpop.f32.mrb[9].mxu1 }
 0x3bf   :  { %1843 = vmatmul.mubr.bf16.vlgmr.msra.gmra.mrb[8].mxu0 %v3537_v13  ;;  %v707_v49 = vpop.f32.mrb[10].mxu1  ;;  %v4509_v13 = vld [vmem:[#allocation15 + $0x338] sm:$0xff]  }
 0x3c0   :  { %3873 = vmatpush3.bf16.msra.mxu0 %v4407_v14  ;;  %1922 = vmatprep.mubr.bf16.mxu0 %v3542_v15  ;;  %v4181_v51 = vpop.f32.mrb[11].mxu1  ;;  %v3549_v14 = vcombine.low %v723_v54, %v723_v54  ;;  %v4516_v15 = vld [vmem:[#allocation16] sm:$0xff]   ;;  %v4535_v47 = vld [vmem:[#allocation18 + $0x18] sm:$0xff]  }
 0x3c1   :  { %3874 = vmatprep.subr.bf16.mxu0 %v4412_v16  ;;  %v4517_v16 = vld [vmem:[#allocation16 + $0x8] sm:$0xff]   ;;  %v3525_v49 = vld [vmem:[#allocation6 + $0x1] ss:$0 sm:$0xff] }
 0x3c4   :  { %3875 = vmatpush3.bf16.msra.mxu0 %v4413_v17  ;;  %v4518_v17 = vld [vmem:[#allocation16 + $0x10] sm:$0xff]  }
 0x3c5   :  { %3876 = vmatprep.subr.bf16.mxu0 %v4416_v18  ;;  %v4519_v18 = vld [vmem:[#allocation16 + $0x18] sm:$0xff]  }
 0x3c8   :  { %3877 = vmatpush3.bf16.msra.mxu0 %v4417_v19  ;;  %v4520_v19 = vld [vmem:[#allocation16 + $0x20] sm:$0xff]  }
 0x3c9   :  { %3878 = vmatprep.subr.bf16.mxu0 %v4420_v20  ;;  %v4521_v20 = vld [vmem:[#allocation16 + $0x28] sm:$0xff]  }
 0x3cc   :  { %3879 = vmatpush3.bf16.msra.mxu0 %v4421_v21 }
 0x3cd   :  { %3880 = vmatprep.subr.bf16.mxu0 %v4424_v22 }
 0x3d0   :  { %3881 = vmatpush3.bf16.msra.mxu0 %v4425_v23  ;;  %v4522_v23 = vld [vmem:[#allocation16 + $0x30] sm:$0xff]  }
 0x3d1   :  { %3882 = vmatprep.subr.bf16.mxu0 %v4428_v24 }
 0x3d4   :  { %3883 = vmatpush3.bf16.msra.mxu0 %v4429_v25 }
 0x3d5   :  { %3884 = vmatprep.subr.bf16.mxu0 %v4432_v26 }
 0x3d8   :  { %3885 = vmatpush3.bf16.msra.mxu0 %v4433_v27  ;;  %v4523_v27 = vld [vmem:[#allocation16 + $0x38] sm:$0xff]  }
 0x3d9   :  { %3886 = vmatprep.subr.bf16.mxu0 %v4436_v28  ;;  %v2131_v28 = vld [vmem:[%s5489_s9] sm:$0xff]  ;;  %s2678_s9 = sld [smem:[#allocation2]] }
 0x3dc   :  { %3887 = vmatpush3.bf16.msra.mxu0 %v4437_v29  ;;  %v5371_v29 = vpack.c.bf16 %v2131_v28, %v2131_v28 }
 0x3dd   :  { %3916 = vmatprep.subr.bf16.mxu0 %v4442_v30  ;;  %v3866_v5 = vpop.f32.mrb[12].mxu1  ;;  %v4524_v30 = vld [vmem:[#allocation19] sm:$0xff]  }
 0x3de   :  { %v3867_v6 = vpop.f32.mrb[13].mxu1 }
 0x3df   :  { %1923 = vmatmul.mubr.bf16.vlgmr.msra.gmra.mrb[12].mxu0 %v3541_v32  ;;  %v3869_v8 = vpop.f32.mrb[14].mxu1  ;;  %v5354_v12 = vadd.f32 %v3867_v6, %v3866_v5  ;;  %v4526_v32 = vld [vmem:[#allocation19 + $0x10] sm:$0xff]   ;;  %s2679_s14 = smax.f32 %s4992_s28, %s2678_s9 }
 0x3e0   :  { %3917 = vmatpush3.bf16.msra.mxu0 %v4445_v33  ;;  %2002 = vmatprep.mubr.bf16.mxu0 %v3546_v34  ;;  %v3870_v10 = vpop.f32.mrb[15].mxu1  ;;  %v4527_v33 = vld [vmem:[#allocation19 + $0x18] sm:$0xff]   ;;  %v4528_v34 = vld [vmem:[#allocation19 + $0x20] sm:$0xff]   ;;  %s2680_s29 = smin.f32 %s4993_s5, %s2679_s14 }
 0x3e1   :  { %3918 = vmatprep.subr.bf16.mxu0 %v4448_v35  ;;  %v4529_v35 = vld [vmem:[#allocation19 + $0x28] sm:$0xff]  }
 0x3e4   :  { %3919 = vmatpush3.bf16.msra.mxu0 %v4449_v36 }
 0x3e5   :  { %3920 = vmatprep.subr.bf16.mxu0 %v4452_v37 }
 0x3e8   :  { %3921 = vmatpush3.bf16.msra.mxu0 %v4453_v38  ;;  %v4530_v38 = vld [vmem:[#allocation19 + $0x30] sm:$0xff]  }
 0x3e9   :  { %3922 = vmatprep.subr.bf16.mxu0 %v4456_v39 }
 0x3ec   :  { %3923 = vmatpush3.bf16.msra.mxu0 %v4457_v40 }
 0x3ed   :  { %3924 = vmatprep.subr.bf16.mxu0 %v4460_v41 }
 0x3f0   :  { %3925 = vmatpush3.bf16.msra.mxu0 %v4461_v42  ;;  %v4531_v42 = vld [vmem:[#allocation19 + $0x38] sm:$0xff]  }
 0x3f1   :  { %3926 = vmatprep.subr.bf16.mxu0 %v4464_v43  ;;  %v4532_v43 = vld [vmem:[#allocation18] sm:$0xff]  }
 0x3f2   :  { %4203 = vmatpush3.bf16.msra.mxu1 %v4532_v43  ;;  %v4542_v43 = vld [vmem:[#allocation22 + $0x10] sm:$0xff]  }
 0x3f3   :  { %4204 = vmatprep.subr.bf16.mxu1 %v4990_v1 }
 0x3f4   :  { %3927 = vmatpush3.bf16.msra.mxu0 %v4465_v44  ;;  %v4533_v44 = vld [vmem:[#allocation18 + $0x8] sm:$0xff]  }
 0x3f5   :  { %3928 = vmatprep.subr.bf16.mxu0 %v4468_v45  ;;  %v4534_v45 = vld [vmem:[#allocation18 + $0x10] sm:$0xff]  }
 0x3f6   :  { %4205 = vmatpush3.bf16.msra.mxu1 %v4533_v44  ;;  %v4543_v44 = vld [vmem:[#allocation22 + $0x18] sm:$0xff]  }
 0x3f7   :  { %4206 = vmatprep.subr.bf16.mxu1 %v4990_v1 }
 0x3f8   :  { %3929 = vmatpush3.bf16.msra.mxu0 %v4469_v48  ;;  %v4536_v48 = vld [vmem:[#allocation18 + $0x20] sm:$0xff]  }
 0x3f9   :  { %3930 = vmatprep.subr.bf16.mxu0 %v4472_v50  ;;  %v4537_v50 = vld [vmem:[#allocation18 + $0x28] sm:$0xff]  }
 0x3fa   :  { %4207 = vmatpush3.bf16.msra.mxu1 %v4534_v45  ;;  %v4544_v45 = vld [vmem:[#allocation22 + $0x20] sm:$0xff]  }
 0x3fb   :  { %4208 = vmatprep.subr.bf16.mxu1 %v4990_v1 }
 0x3fc   :  { %3931 = vmatpush3.bf16.msra.mxu0 %v4473_v52 }
 0x3fd   :  { %3960 = vmatprep.subr.bf16.mxu0 %v4478_v53  ;;  %v3910_v21 = vpop.f32.mrb[16].mxu1 }
 0x3fe   :  { %v3911_v22 = vpop.f32.mrb[17].mxu1  ;;  %4209 = vmatpush3.bf16.msra.mxu1 %v4535_v47  ;;  %v4545_v47 = vld [vmem:[#allocation22 + $0x28] sm:$0xff]  }
 0x3ff   :  { %2003 = vmatmul.mubr.bf16.vlgmr.msra.gmra.mrb[16].mxu0 %v3545_v55  ;;  %v3913_v24 = vpop.f32.mrb[18].mxu1  ;;  %v5365_v26 = vadd.f32 %v3911_v22, %v3910_v21  ;;  %4210 = vmatprep.subr.bf16.mxu1 %v4990_v1 }
 0x400   :  { %3961 = vmatpush3.bf16.msra.mxu0 %v4481_v56  ;;  %2082 = vmatprep.mubr.bf16.mxu0 %v3550_v57  ;;  %v3914_v25 = vpop.f32.mrb[19].mxu1  ;;  %v4538_v57 = vld [vmem:[#allocation18 + $0x30] sm:$0xff]   ;;  %v4540_v24 = vld [vmem:[#allocation22] sm:$0xff]  }
 0x401   :  { %3962 = vmatprep.subr.bf16.mxu0 %v4484_v58  ;;  %v3535_v58 = vld [vmem:[#allocation6 + $0x2] ss:$0 sm:$0xff] }
 0x402   :  { %4211 = vmatpush3.bf16.msra.mxu1 %v4536_v48  ;;  %v4546_v48 = vld [vmem:[#allocation22 + $0x30] sm:$0xff]  }
 0x403   :  { %4212 = vmatprep.subr.bf16.mxu1 %v4990_v1 }
 0x404   :  { %3963 = vmatpush3.bf16.msra.mxu0 %v4485_v59 }
 0x405   :  { %3964 = vmatprep.subr.bf16.mxu0 %v4488_v60 }
 0x406   :  { %4213 = vmatpush3.bf16.msra.mxu1 %v4537_v50  ;;  %v3703_v50 = vld [vmem:[#allocation6 + $0xa] ss:$0 sm:$0xff] }
 0x407   :  { %4214 = vmatprep.subr.bf16.mxu1 %v4990_v1 }
 0x408   :  { %3965 = vmatpush3.bf16.msra.mxu0 %v4489_v61 }
 0x409   :  { %3966 = vmatprep.subr.bf16.mxu0 %v4492_v62 }
 0x40a   :  { %4215 = vmatpush3.bf16.msra.mxu1 %v4538_v57  ;;  %v4572_v57 = vld [vmem:[#allocation21] sm:$0xff]  }
 0x40b   :  { %4216 = vmatprep.subr.bf16.mxu1 %v4990_v1 }
 0x40c   :  { %3967 = vmatpush3.bf16.msra.mxu0 %v4493_v63 }
 0x40d   :  { %3968 = vmatprep.subr.bf16.mxu0 %v4496_v0  ;;  %v4539_v0 = vld [vmem:[#allocation18 + $0x38] sm:$0xff]  }
 0x40e   :  { %4217 = vmatpush3.bf16.msra.mxu1 %v4539_v0 }
 0x40f   :  { %4242 = vmatprep.subr.bf16.mxu1 %v4572_v57 }
 0x410   :  { %3969 = vmatpush3.bf16.msra.mxu0 %v4497_v2 }
 0x411   :  { %3970 = vmatprep.subr.bf16.mxu0 %v4500_v3 }
 0x414   :  { %3971 = vmatpush3.bf16.msra.mxu0 %v4501_v11  ;;  %v3536_v11 = vld [vmem:[#allocation6 + $0x3] ss:$0 sm:$0xff] }
 0x415   :  { %3972 = vmatprep.subr.bf16.mxu0 %v4504_v4 }
 0x418   :  { %3973 = vmatpush3.bf16.msra.mxu0 %v4505_v7 }
 0x419   :  { %3974 = vmatprep.subr.bf16.mxu0 %v4508_v9 }
 0x41c   :  { %3975 = vmatpush3.bf16.msra.mxu0 %v4509_v13 }
 0x41d   :  { %4182 = vmatprep.subr.bf16.mxu0 %v4990_v1  ;;  %v3954_v36 = vpop.f32.mrb[20].mxu1 }
 0x41e   :  { %v3955_v37 = vpop.f32.mrb[21].mxu1 }
 0x41f   :  { %2083 = vmatmul.mubr.bf16.vlgmr.msra.gmra.mrb[20].mxu0 %v3549_v14  ;;  %v3957_v39 = vpop.f32.mrb[22].mxu1  ;;  %v5383_v41 = vadd.f32 %v3955_v37, %v3954_v36 }
 0x420   :  { %4183 = vmatpush3.bf16.msra.mxu0 %v4516_v15  ;;  %4198 = vmatprep.mubr.msk.bf16.mxu0 %vm4991_vm0, %v4990_v1  ;;  %v3958_v40 = vpop.f32.mrb[23].mxu1 }
 0x421   :  { %4184 = vmatprep.subr.bf16.mxu0 %v4990_v1 }
 0x424   :  { %4185 = vmatpush3.bf16.msra.mxu0 %v4517_v16 }
 0x425   :  { %4186 = vmatprep.subr.bf16.mxu0 %v4990_v1 }
 0x428   :  { %4187 = vmatpush3.bf16.msra.mxu0 %v4518_v17 }
 0x429   :  { %4188 = vmatprep.subr.bf16.mxu0 %v4990_v1 }
 0x42c   :  { %4189 = vmatpush3.bf16.msra.mxu0 %v4519_v18 }
 0x42d   :  { %4190 = vmatprep.subr.bf16.mxu0 %v4990_v1 }
 0x430   :  { %4191 = vmatpush3.bf16.msra.mxu0 %v4520_v19 }
 0x431   :  { %4192 = vmatprep.subr.bf16.mxu0 %v4990_v1 }
 0x434   :  { %4193 = vmatpush3.bf16.msra.mxu0 %v4521_v20 }
 0x435   :  { %4194 = vmatprep.subr.bf16.mxu0 %v4990_v1 }
 0x438   :  { %4195 = vmatpush3.bf16.msra.mxu0 %v4522_v23 }
 0x439   :  { %4196 = vmatprep.subr.bf16.mxu0 %v4990_v1 }
 0x43c   :  { %4197 = vmatpush3.bf16.msra.mxu0 %v4523_v27 }
 0x43d   :  { %4222 = vmatprep.subr.bf16.mxu0 %v4990_v1  ;;  %v3998_v54 = vpop.f32.mrb[24].mxu1 }
 0x43e   :  { %v3999_v56 = vpop.f32.mrb[25].mxu1 }
 0x43f   :  { %4199 = vmatmul.mubr.bf16.vlgmr.msra.gmra.mrb[24].mxu0 %v5371_v29  ;;  %v4000_v59 = vadd.f32 %v3999_v56, %v3998_v54  ;;  %v4001_v60 = vpop.f32.mrb[26].mxu1 }
 0x440   :  { %4223 = vmatpush3.bf16.msra.mxu0 %v4524_v30  ;;  %4238 = vmatprep.mubr.msk.bf16.mxu0 %vm4991_vm0, %v4990_v1  ;;  %v4002_v62 = vpop.f32.mrb[27].mxu1 }
 0x441   :  { %4224 = vmatprep.subr.bf16.mxu0 %v4990_v1 }
 0x444   :  { %4225 = vmatpush3.bf16.msra.mxu0 %v4525_v31 }
 0x445   :  { %4226 = vmatprep.subr.bf16.mxu0 %v4990_v1 }
 0x448   :  { %4227 = vmatpush3.bf16.msra.mxu0 %v4526_v32 }
 0x449   :  { %4228 = vmatprep.subr.bf16.mxu0 %v4990_v1 }
 0x44c   :  { %4229 = vmatpush3.bf16.msra.mxu0 %v4527_v33 }
 0x44d   :  { %4230 = vmatprep.subr.bf16.mxu0 %v4990_v1 }
 0x450   :  { %4231 = vmatpush3.bf16.msra.mxu0 %v4528_v34 }
 0x451   :  { %4232 = vmatprep.subr.bf16.mxu0 %v4990_v1 }
 0x454   :  { %4233 = vmatpush3.bf16.msra.mxu0 %v4529_v35  ;;  %v3681_v35 = vld [vmem:[#allocation6 + $0x4] ss:$0 sm:$0xff] }
 0x455   :  { %4234 = vmatprep.subr.bf16.mxu0 %v4990_v1 }
 0x458   :  { %4235 = vmatpush3.bf16.msra.mxu0 %v4530_v38 }
 0x459   :  { %4236 = vmatprep.subr.bf16.mxu0 %v4990_v1 }
 0x45c   :  { %4237 = vmatpush3.bf16.msra.mxu0 %v4531_v42  ;;  %v4541_v42 = vld [vmem:[#allocation22 + $0x8] sm:$0xff]  }
 0x45d   :  { %4262 = vmatprep.subr.bf16.mxu0 %v4990_v1 }
 0x472   :  { %v601_v51 = vpop.f32.mrb[4].mxu0 }
 0x473   :  { %v602_v52 = vadd.f32 %v3525_v49, %v601_v51  ;;  %v4161_v53 = vpop.f32.mrb[5].mxu0  ;;  %v4547_v49 = vld [vmem:[#allocation22 + $0x38] sm:$0xff]  }
 0x475   :  { %v605_v55 = vmax.f32 %v602_v52, 0.0 }
 0x477   :  { %v710_v61 = vadd.f32 %v5352_v46, %v605_v55 }
 0x479   :  { %v716_v63 = vadd.f32 %v3535_v58, %v710_v61 }
 0x47b   :  { %v5395_v2 = vpack.c.bf16 %v716_v63, %v716_v63 }
 0x47d   :  { %4239 = vmatmul.mubr.bf16.vlgmr.msra.gmra.mrb[28].mxu0 %v5395_v2 }
 0x47e   :  { %4278 = vmatprep.mubr.msk.bf16.mxu0 %vm4991_vm0, %v4990_v1  ;;  %4263 = vmatpush3.bf16.msra.mxu0 %v4540_v24 }
 0x47f   :  { %4264 = vmatprep.subr.bf16.mxu0 %v4990_v1 }
 0x482   :  { %4265 = vmatpush3.bf16.msra.mxu0 %v4541_v42 }
 0x483   :  { %4266 = vmatprep.subr.bf16.mxu0 %v4990_v1 }
 0x486   :  { %4267 = vmatpush3.bf16.msra.mxu0 %v4542_v43  ;;  %v3712_v43 = vld [vmem:[#allocation6 + $0xb] ss:$0 sm:$0xff] }
 0x487   :  { %4268 = vmatprep.subr.bf16.mxu0 %v4990_v1 }
 0x48a   :  { %4269 = vmatpush3.bf16.msra.mxu0 %v4543_v44 }
 0x48b   :  { %4270 = vmatprep.subr.bf16.mxu0 %v4990_v1 }
 0x48e   :  { %4271 = vmatpush3.bf16.msra.mxu0 %v4544_v45  ;;  %v4579_v45 = vld [vmem:[#allocation21 + $0x38] sm:$0xff]  }
 0x48f   :  { %4272 = vmatprep.subr.bf16.mxu0 %v4990_v1 }
 0x492   :  { %v3844_v3 = vpop.f32.mrb[8].mxu0  ;;  %4273 = vmatpush3.bf16.msra.mxu0 %v4545_v47  ;;  %v3713_v47 = vld [vmem:[#allocation6 + $0xc] ss:$0 sm:$0xff] }
 0x493   :  { %v3845_v4 = vpop.f32.mrb[9].mxu0  ;;  %4274 = vmatprep.subr.bf16.mxu0 %v4990_v1 }
 0x494   :  { %v3846_v5 = vadd.f32 %v3845_v4, %v3844_v3  ;;  %v3847_v6 = vpop.f32.mrb[10].mxu0  ;;  %v3690_v4 = vld [vmem:[#allocation6 + $0x5] ss:$0 sm:$0xff] }
 0x495   :  { %v3848_v46 = vpop.f32.mrb[11].mxu0  ;;  %v3691_v6 = vld [vmem:[#allocation6 + $0x6] ss:$0 sm:$0xff] }
 0x496   :  { %v1845_v7 = vadd.f32 %v3846_v5, %v3536_v11  ;;  %4275 = vmatpush3.bf16.msra.mxu0 %v4546_v48 }
 0x497   :  { %4276 = vmatprep.subr.bf16.mxu0 %v4990_v1 }
 0x498   :  { %v1885_v8 = vadd.f32 %v5354_v12, %v1845_v7 }
 0x49a   :  { %4277 = vmatpush3.bf16.msra.mxu0 %v4547_v49 }
 0x49b   :  { %4302 = vmatprep.subr.bf16.mxu0 %v4990_v1 }
 0x4b2   :  { %v3888_v9 = vpop.f32.mrb[12].mxu0 }
 0x4b3   :  { %v3889_v10 = vpop.f32.mrb[13].mxu0 }
 0x4b4   :  { %v3890_v13 = vadd.f32 %v3889_v10, %v3888_v9  ;;  %v3891_v14 = vpop.f32.mrb[14].mxu0  ;;  %v4549_v10 = vld [vmem:[#allocation22 + $0x88] sm:$0xff]  }
 0x4b5   :  { %v3892_v15 = vpop.f32.mrb[15].mxu0  ;;  %v4551_v14 = vld [vmem:[#allocation22 + $0x98] sm:$0xff]  }
 0x4b6   :  { %v1925_v16 = vadd.f32 %v3890_v13, %v1885_v8  ;;  %v4548_v8 = vld [vmem:[#allocation22 + $0x80] sm:$0xff]   ;;  %v4550_v13 = vld [vmem:[#allocation22 + $0x90] sm:$0xff]  }
 0x4b7   :  { %v4552_v15 = vld [vmem:[#allocation22 + $0xa0] sm:$0xff]  }
 0x4b8   :  { %v1965_v17 = vadd.f32 %v5365_v26, %v1925_v16  ;;  %v3692_v16 = vld [vmem:[#allocation6 + $0x7] ss:$0 sm:$0xff] }
 0x4d2   :  { %v3932_v18 = vpop.f32.mrb[16].mxu0 }
 0x4d3   :  { %v3933_v19 = vpop.f32.mrb[17].mxu0 }
 0x4d4   :  { %v3934_v20 = vadd.f32 %v3933_v19, %v3932_v18  ;;  %v3935_v21 = vpop.f32.mrb[18].mxu0 }
 0x4d5   :  { %v3936_v22 = vpop.f32.mrb[19].mxu0 }
 0x4d6   :  { %v2005_v23 = vadd.f32 %v3934_v20, %v1965_v17  ;;  %v4553_v17 = vld [vmem:[#allocation22 + $0xa8] sm:$0xff]   ;;  %v4554_v22 = vld [vmem:[#allocation22 + $0xb0] sm:$0xff]  }
 0x4d8   :  { %v2045_v25 = vadd.f32 %v5383_v41, %v2005_v23 }
 0x4f2   :  { %v3976_v12 = vpop.f32.mrb[20].mxu0 }
 0x4f3   :  { %v3977_v27 = vpop.f32.mrb[21].mxu0 }
 0x4f4   :  { %v3978_v28 = vadd.f32 %v3977_v27, %v3976_v12  ;;  %v3979_v30 = vpop.f32.mrb[22].mxu0  ;;  %v4556_v12 = vld [vmem:[#allocation24 + $0xc0] sm:$0xff]  }
 0x4f5   :  { %v3980_v31 = vpop.f32.mrb[23].mxu0  ;;  %v4573_v30 = vld [vmem:[#allocation21 + $0x8] sm:$0xff]  }
 0x4f6   :  { %v2085_v32 = vadd.f32 %v3978_v28, %v2045_v25  ;;  %v4555_v25 = vld [vmem:[#allocation22 + $0xb8] sm:$0xff]  }
 0x4f8   :  { %v2125_v33 = vadd.f32 %v4000_v59, %v2085_v32 }
 0x4fa   :  { %v2130_v26 = vmax.f32 %v2125_v33, 0.0 }
 0x4fc   :  { %v5404_v34 = vpack.c.bf16 %v2130_v26, %v2130_v26  ;;  %v4574_v26 = vld [vmem:[#allocation21 + $0x10] sm:$0xff]  }
 0x4fe   :  { %4219 = vmatmul.mubr.bf16.vlgmr.msra.gmra.mrb[28].mxu1 %v5404_v34 }
 0x4ff   :  { %4243 = vmatpush3.bf16.msra.mxu1 %v4572_v57  ;;  %v4563_v57 = vld [vmem:[#allocation24 + $0x98] sm:$0xff]  }
 0x500   :  { %4244 = vmatprep.subr.bf16.mxu1 %v4573_v30 }
 0x503   :  { %4245 = vmatpush3.bf16.msra.mxu1 %v4573_v30  ;;  %v4587_v30 = vld [vmem:[#allocation22 + $0x78] sm:$0xff]  }
 0x504   :  { %4246 = vmatprep.subr.bf16.mxu1 %v4574_v26 }
 0x507   :  { %4247 = vmatpush3.bf16.msra.mxu1 %v4574_v26 }
 0x512   :  { %v2236_v36 = vpop.f32.mrb[24].mxu0 }
 0x513   :  { %v2237_v37 = vadd.f32 %v3681_v35, %v2236_v36  ;;  %v4200_v38 = vpop.f32.mrb[25].mxu0 }
 0x514   :  { %v2239_v39 = vpop.f32.mrb[26].mxu0  ;;  %v4576_v38 = vld [vmem:[#allocation21 + $0x20] sm:$0xff]  }
 0x515   :  { %2242 = vadd.xlane.f32.xlu0 %v2237_v37  ;;  %v2244_v40 = vmul.f32 %v2237_v37, %v2237_v37  ;;  %v4201_v41 = vpop.f32.mrb[27].mxu0  ;;  %v4577_v39 = vld [vmem:[#allocation21 + $0x28] sm:$0xff]  }
 0x517   :  { %2245 = vadd.xlane.f32.xlu1 %v2244_v40  ;;  %v4578_v40 = vld [vmem:[#allocation21 + $0x30] sm:$0xff]  }
 0x550   :  { %v2506_v51 = vpop.f32.mrb[28].mxu0 }
 0x551   :  { %v5414_v52 = vadd.f32 %v3703_v50, %v2506_v51  ;;  %v4240_v53 = vpop.f32.mrb[29].mxu0  ;;  %v4557_v50 = vld [vmem:[#allocation24 + $0x80] sm:$0xff]  }
 0x552   :  { %v2509_v54 = vpop.f32.mrb[30].mxu0  ;;  %v4558_v53 = vld [vmem:[#allocation24 + $0xc8] sm:$0xff]  }
 0x553   :  { %2512 = vadd.xlane.f32.xlu1 %v5414_v52  ;;  %v4241_v55 = vpop.f32.mrb[31].mxu0  ;;  %v2514_v56 = vmul.f32 %v5414_v52, %v5414_v52  ;;  %v4560_v54 = vld [vmem:[#allocation24 + $0xd0] sm:$0xff]  }
 0x554   :  { %v4561_v55 = vld [vmem:[#allocation24 + $0x90] sm:$0xff]  }
 0x557   :  { %2515 = vadd.xlane.f32.xlu1 %v2514_v56  ;;  %v4562_v56 = vld [vmem:[#allocation24 + $0xd8] sm:$0xff]  }
 0x5a2   :  { %v2243_v58 = vpop.xlane.xlu0 %2242 }
 0x5a3   :  { %v2247_v59 = vmul.f32 0.03125, %v2243_v58  ;;  %v4564_v58 = vld [vmem:[#allocation24 + $0xe0] sm:$0xff]  }
 0x5a4   :  { %v2246_v60 = vpop.xlane.xlu1 %2245 }
 0x5a5   :  { %v2249_v61 = vmul.f32 %v2247_v59, %v2247_v59  ;;  %v2248_v62 = vmul.f32 0.03125, %v2246_v60  ;;  %v2251_v3 = vsub.f32 %v2237_v37, %v2247_v59  ;;  %v4575_v37 = vld [vmem:[#allocation21 + $0x18] sm:$0xff]   ;;  %v4565_v59 = vld [vmem:[#allocation24 + $0xa0] sm:$0xff]   ;;  %v4566_v60 = vld [vmem:[#allocation24 + $0xe8] sm:$0xff]  }
 0x5a6   :  { %4248 = vmatprep.subr.bf16.mxu1 %v4575_v37 }
 0x5a7   :  { %v2250_v63 = vsub.f32 %v2248_v62, %v2249_v61  ;;  %4249 = vmatpush3.bf16.msra.mxu1 %v4575_v37  ;;  %v4567_v61 = vld [vmem:[#allocation24 + $0xa8] sm:$0xff]   ;;  %v4568_v62 = vld [vmem:[#allocation24 + $0xf0] sm:$0xff]  }
 0x5a8   :  { %4250 = vmatprep.subr.bf16.mxu1 %v4576_v38 }
 0x5a9   :  { %v2252_v0 = vadd.f32 1e-05, %v2250_v63  ;;  %v4570_v63 = vld [vmem:[#allocation24 + $0xf8] sm:$0xff]  }
 0x5ab   :  { %4604 = vrsqrt.f32 %v2252_v0  ;;  %4251 = vmatpush3.bf16.msra.mxu1 %v4576_v38  ;;  %v4571_v0 = vld [vmem:[#allocation24 + $0xb8] sm:$0xff]  }
 0x5ac   :  { %4252 = vmatprep.subr.bf16.mxu1 %v4577_v39 }
 0x5af   :  { %4253 = vmatpush3.bf16.msra.mxu1 %v4577_v39 }
 0x5b0   :  { %4254 = vmatprep.subr.bf16.mxu1 %v4578_v40 }
 0x5b3   :  { %4255 = vmatpush3.bf16.msra.mxu1 %v4578_v40 }
 0x5b4   :  { %4256 = vmatprep.subr.bf16.mxu1 %v4579_v45 }
 0x5b5   :  { %v4605_v11 = vpop.eup %4604 }
 0x5b6   :  { %v2254_v5 = vmul.f32 %v4605_v11, %v2251_v3 }
 0x5b7   :  { %4257 = vmatpush3.bf16.msra.mxu1 %v4579_v45 }
 0x5b8   :  { %v2260_v46 = vmul.f32 %v3690_v4, %v2254_v5  ;;  %4282 = vmatprep.subr.bf16.mxu1 %v4990_v1 }
 0x5ba   :  { %v5419_v7 = vadd.f32 %v3691_v6, %v2260_v46 }
 0x5bc   :  { %v2714_v9 = vpack.c.bf16 %v5419_v7, %v5419_v7 }
 0x5be   :  { %4279 = vmatmul.mubr.bf16.vlgmr.msra.gmra.mrb[32].mxu0 %v2714_v9 }
 0x5bf   :  { %4303 = vmatpush3.bf16.msra.mxu0 %v4548_v8  ;;  %4318 = vmatprep.mubr.msk.bf16.mxu0 %vm4991_vm0, %v4990_v1 }
 0x5c0   :  { %4304 = vmatprep.subr.bf16.mxu0 %v4990_v1 }
 0x5c3   :  { %4305 = vmatpush3.bf16.msra.mxu0 %v4549_v10 }
 0x5c4   :  { %4306 = vmatprep.subr.bf16.mxu0 %v4990_v1 }
 0x5c7   :  { %4307 = vmatpush3.bf16.msra.mxu0 %v4550_v13  ;;  %v3701_v13 = vld [vmem:[#allocation6 + $0x8] ss:$0 sm:$0xff] }
 0x5c8   :  { %4308 = vmatprep.subr.bf16.mxu0 %v4990_v1 }
 0x5cb   :  { %4309 = vmatpush3.bf16.msra.mxu0 %v4551_v14 }
 0x5cc   :  { %4310 = vmatprep.subr.bf16.mxu0 %v4990_v1 }
 0x5cf   :  { %4311 = vmatpush3.bf16.msra.mxu0 %v4552_v15  ;;  %v3702_v15 = vld [vmem:[#allocation6 + $0x9] ss:$0 sm:$0xff] }
 0x5d0   :  { %4312 = vmatprep.subr.bf16.mxu0 %v4990_v1 }
 0x5d1   :  { %v2371_v18 = vpop.f32.mrb[28].mxu1 }
 0x5d2   :  { %v5430_v19 = vadd.f32 %v3692_v16, %v2371_v18  ;;  %v4220_v20 = vpop.f32.mrb[29].mxu1  ;;  %v4580_v18 = vld [vmem:[#allocation22 + $0x40] sm:$0xff]  }
 0x5d3   :  { %v2374_v21 = vpop.f32.mrb[30].mxu1  ;;  %4313 = vmatpush3.bf16.msra.mxu0 %v4553_v17  ;;  %v4581_v20 = vld [vmem:[#allocation22 + $0x48] sm:$0xff]  }
 0x5d4   :  { %2377 = vadd.xlane.f32.xlu0 %v5430_v19  ;;  %v4221_v23 = vpop.f32.mrb[31].mxu1  ;;  %4314 = vmatprep.subr.bf16.mxu0 %v4990_v1  ;;  %v2379_v24 = vmul.f32 %v5430_v19, %v5430_v19  ;;  %v4583_v21 = vld [vmem:[#allocation22 + $0x58] sm:$0xff]  }
 0x5d5   :  { %v4585_v23 = vld [vmem:[#allocation22 + $0x68] sm:$0xff]  }
 0x5d7   :  { %4315 = vmatpush3.bf16.msra.mxu0 %v4554_v22  ;;  %v4584_v22 = vld [vmem:[#allocation22 + $0x60] sm:$0xff]  }
 0x5d8   :  { %2380 = vadd.xlane.f32.xlu0 %v2379_v24  ;;  %4316 = vmatprep.subr.bf16.mxu0 %v4990_v1 }
 0x5db   :  { %4317 = vmatpush3.bf16.msra.mxu0 %v4555_v25 }
 0x5dc   :  { %4090 = vmatprep.subr.bf16.mxu0 %v4556_v12 }
 0x5e0   :  { %v2513_v27 = vpop.xlane.xlu1 %2512 }
 0x5e1   :  { %v2517_v28 = vmul.f32 0.03125, %v2513_v27 }
 0x5e3   :  { %v2519_v32 = vmul.f32 %v2517_v28, %v2517_v28  ;;  %v2521_v41 = vsub.f32 %v5414_v52, %v2517_v28  ;;  %v4559_v52 = vld [vmem:[#allocation24 + $0x88] sm:$0xff]   ;;  %v4586_v28 = vld [vmem:[#allocation22 + $0x70] sm:$0xff]  }
 0x5e4   :  { %v2516_v31 = vpop.xlane.xlu1 %2515 }
 0x5e5   :  { %v2518_v33 = vmul.f32 0.03125, %v2516_v31 }
 0x5e7   :  { %v2520_v35 = vsub.f32 %v2518_v33, %v2519_v32 }
 0x5e9   :  { %v2522_v36 = vadd.f32 1e-05, %v2520_v35 }
 0x5eb   :  { %4606 = vrsqrt.f32 %v2522_v36 }
 0x5f5   :  { %v4607_v42 = vpop.eup %4606 }
 0x5f6   :  { %v2524_v44 = vmul.f32 %v4607_v42, %v2521_v41 }
 0x5f8   :  { %v2530_v48 = vmul.f32 %v3712_v43, %v2524_v44  ;;  %v3725_v43 = vld [vmem:[#allocation6 + $0xf] ss:$0 sm:$0xff] }
 0x5fa   :  { %v5438_v49 = vadd.f32 %v3713_v47, %v2530_v48 }
 0x5fc   :  { %v2538_v51 = vpack.c.bf16 %v5438_v49, %v5438_v49 }
 0x5fe   :  { %4319 = vmatmul.mubr.bf16.vlgmr.msra.gmra.mrb[36].mxu0 %v2538_v51 }
 0x5ff   :  { %4091 = vmatpush3.bf16.msra.mxu0 %v4557_v50  ;;  %3466 = vmatprep.mubr.bf16.mxu0 %v5371_v29  ;;  %v4569_v29 = vld [vmem:[#allocation24 + $0xb0] sm:$0xff]  }
 0x600   :  { %4092 = vmatprep.subr.bf16.mxu0 %v4558_v53 }
 0x603   :  { %4093 = vmatpush3.bf16.msra.mxu0 %v4559_v52 }
 0x604   :  { %4094 = vmatprep.subr.bf16.mxu0 %v4560_v54 }
 0x607   :  { %4095 = vmatpush3.bf16.msra.mxu0 %v4561_v55  ;;  %v3749_v55 = vld [vmem:[#allocation6 + $0x11] ss:$0 sm:$0xff] }
 0x608   :  { %4096 = vmatprep.subr.bf16.mxu0 %v4562_v56 }
 0x60b   :  { %4097 = vmatpush3.bf16.msra.mxu0 %v4563_v57 }
 0x60c   :  { %4098 = vmatprep.subr.bf16.mxu0 %v4564_v58 }
 0x60f   :  { %4099 = vmatpush3.bf16.msra.mxu0 %v4565_v59 }
 0x610   :  { %4100 = vmatprep.subr.bf16.mxu0 %v4566_v60 }
 0x613   :  { %4101 = vmatpush3.bf16.msra.mxu0 %v4567_v61 }
 0x614   :  { %4102 = vmatprep.subr.bf16.mxu0 %v4568_v62  ;;  %v3734_v62 = vld [vmem:[#allocation6 + $0x12] ss:$0 sm:$0xff] }
 0x617   :  { %4103 = vmatpush3.bf16.msra.mxu0 %v4569_v29 }
 0x618   :  { %4104 = vmatprep.subr.bf16.mxu0 %v4570_v63 }
 0x61b   :  { %4105 = vmatpush3.bf16.msra.mxu0 %v4571_v0 }
 0x61e   :  { %3467 = vmatmul.mubr.bf16.vlgmr.msra.gmra.mrb[40].mxu0 %v5404_v34 }
 0x661   :  { %v2378_v3 = vpop.xlane.xlu0 %2377 }
 0x662   :  { %v2382_v11 = vmul.f32 0.03125, %v2378_v3  ;;  %v3758_v3 = vld [vmem:[#allocation6 + $0x14] ss:$0 sm:$0xff] }
 0x664   :  { %v2384_v5 = vmul.f32 %v2382_v11, %v2382_v11  ;;  %v2386_v9 = vsub.f32 %v5430_v19, %v2382_v11  ;;  %v4582_v19 = vld [vmem:[#allocation22 + $0x50] sm:$0xff]  }
 0x665   :  { %v2381_v4 = vpop.xlane.xlu0 %2380 }
 0x666   :  { %v2383_v6 = vmul.f32 0.03125, %v2381_v4  ;;  %v3737_v4 = vld [vmem:[#allocation6 + $0x10] ss:$0 sm:$0xff] }
 0x668   :  { %v2385_v46 = vsub.f32 %v2383_v6, %v2384_v5 }
 0x66a   :  { %v2387_v8 = vadd.f32 1e-05, %v2385_v46 }
 0x66c   :  { %4608 = vrsqrt.f32 %v2387_v8 }
 0x676   :  { %v4609_v10 = vpop.eup %4608 }
 0x677   :  { %v2389_v14 = vmul.f32 %v4609_v10, %v2386_v9  ;;  %v3746_v9 = vld [vmem:[#allocation6 + $0x13] ss:$0 sm:$0xff] }
 0x679   :  { %v2395_v16 = vmul.f32 %v3701_v13, %v2389_v14 }
 0x67b   :  { %v5446_v17 = vadd.f32 %v3702_v15, %v2395_v16  ;;  %v4588_v15 = vld [vmem:[#allocation24 + $0x40] sm:$0xff]  }
 0x67c   :  { %v4589_v16 = vld [vmem:[#allocation24] sm:$0xff]  }
 0x67d   :  { %v2537_v34 = vpack.c.bf16 %v5446_v17, %v5419_v7  ;;  %v2842_v31 = vpack.c.bf16 %v5446_v17, %v5446_v17 }
 0x67f   :  { %4258 = vmatprep.mubr.bf16.mxu1 %v2537_v34  ;;  %v4590_v34 = vld [vmem:[#allocation24 + $0x48] sm:$0xff]  }
 0x680   :  { %4259 = vmatmul.mubr.bf16.vlgmr.msra.gmra.mrb[32].mxu1 %v2538_v51  ;;  %v3723_v51 = vld [vmem:[#allocation6 + $0xe] ss:$0 sm:$0xff] }
 0x681   :  { %4283 = vmatpush3.bf16.msra.mxu1 %v4580_v18  ;;  %4298 = vmatprep.mubr.msk.bf16.mxu1 %vm4991_vm0, %v4990_v1  ;;  %v4591_v18 = vld [vmem:[#allocation24 + $0x8] sm:$0xff]  }
 0x682   :  { %4284 = vmatprep.subr.bf16.mxu1 %v4990_v1 }
 0x685   :  { %4285 = vmatpush3.bf16.msra.mxu1 %v4581_v20  ;;  %v4592_v20 = vld [vmem:[#allocation24 + $0x50] sm:$0xff]  }
 0x686   :  { %4286 = vmatprep.subr.bf16.mxu1 %v4990_v1 }
 0x689   :  { %4287 = vmatpush3.bf16.msra.mxu1 %v4582_v19  ;;  %v4593_v19 = vld [vmem:[#allocation24 + $0x10] sm:$0xff]  }
 0x68a   :  { %4288 = vmatprep.subr.bf16.mxu1 %v4990_v1 }
 0x68d   :  { %4289 = vmatpush3.bf16.msra.mxu1 %v4583_v21  ;;  %v4594_v21 = vld [vmem:[#allocation24 + $0x58] sm:$0xff]  }
 0x68e   :  { %4290 = vmatprep.subr.bf16.mxu1 %v4990_v1 }
 0x691   :  { %4291 = vmatpush3.bf16.msra.mxu1 %v4584_v22  ;;  %v2818_v24 = vpop.f32.mrb[32].mxu0  ;;  %v4595_v22 = vld [vmem:[#allocation24 + $0x18] sm:$0xff]  }
 0x692   :  { %4292 = vmatprep.subr.bf16.mxu1 %v4990_v1  ;;  %v4280_v25 = vpop.f32.mrb[33].mxu0  ;;  %v2819_v53 = vadd.f32 %v3725_v43, %v2818_v24  ;;  %v4597_v24 = vld [vmem:[#allocation24 + $0x20] sm:$0xff]  }
 0x693   :  { %v2821_v12 = vpop.f32.mrb[34].mxu0  ;;  %v4598_v25 = vld [vmem:[#allocation24 + $0x68] sm:$0xff]  }
 0x694   :  { %v4281_v27 = vpop.f32.mrb[35].mxu0  ;;  %v2824_v59 = vmax.f32 %v2819_v53, 0.0  ;;  %v4599_v12 = vld [vmem:[#allocation24 + $0x28] sm:$0xff]  }
 0x695   :  { %4293 = vmatpush3.bf16.msra.mxu1 %v4585_v23  ;;  %v4596_v23 = vld [vmem:[#allocation24 + $0x60] sm:$0xff]   ;;  %v4600_v27 = vld [vmem:[#allocation24 + $0x70] sm:$0xff]  }
 0x696   :  { %4294 = vmatprep.subr.bf16.mxu1 %v4990_v1  ;;  %v2830_v0 = vmul.f32 %v3734_v62, %v2824_v59 }
 0x699   :  { %4295 = vmatpush3.bf16.msra.mxu1 %v4586_v28  ;;  %v4601_v28 = vld [vmem:[#allocation24 + $0x30] sm:$0xff]  }
 0x69a   :  { %4296 = vmatprep.subr.bf16.mxu1 %v4990_v1  ;;  %v2681_v1 = vstv %s2680_s29 }
 0x69b   :  { %4610 = vrcp.f32 %v2681_v1 }
 0x69d   :  { %4297 = vmatpush3.bf16.msra.mxu1 %v4587_v30  ;;  %v4602_v30 = vld [vmem:[#allocation24 + $0x78] sm:$0xff]  }
 0x69e   :  { %4068 = vmatprep.subr.bf16.mxu1 %v4588_v15 }
 0x6a0   :  { %4299 = vmatmul.mubr.bf16.vlgmr.msra.gmra.mrb[36].mxu1 %v2842_v31  ;;  %v4603_v31 = vld [vmem:[#allocation24 + $0x38] sm:$0xff]  }
 0x6a1   :  { %3426 = vmatprep.mubr.bf16.mxu1 %v5395_v2  ;;  %v3714_v2 = vld [vmem:[#allocation6 + $0xd] ss:$0 sm:$0xff]  ;;  %4069 = vmatpush3.bf16.msra.mxu1 %v4589_v16 }
 0x6a2   :  { %4070 = vmatprep.subr.bf16.mxu1 %v4590_v34 }
 0x6a5   :  { %v4611_v41 = vpop.eup %4610  ;;  %4071 = vmatpush3.bf16.msra.mxu1 %v4591_v18 }
 0x6a6   :  { %4322 = vpush %v4611_v41  ;;  %4072 = vmatprep.subr.bf16.mxu1 %v4592_v20 }
 0x6a9   :  { %4073 = vmatpush3.bf16.msra.mxu1 %v4593_v19 }
 0x6aa   :  { %4074 = vmatprep.subr.bf16.mxu1 %v4594_v21 }
 0x6ad   :  { %4075 = vmatpush3.bf16.msra.mxu1 %v4595_v22 }
 0x6ae   :  { %4076 = vmatprep.subr.bf16.mxu1 %v4596_v23 }
 0x6b1   :  { %4077 = vmatpush3.bf16.msra.mxu1 %v4597_v24 }
 0x6b2   :  { %4078 = vmatprep.subr.bf16.mxu1 %v4598_v25 }
 0x6b5   :  { %4079 = vmatpush3.bf16.msra.mxu1 %v4599_v12 }
 0x6b6   :  { %4080 = vmatprep.subr.bf16.mxu1 %v4600_v27 }
 0x6b9   :  { %4081 = vmatpush3.bf16.msra.mxu1 %v4601_v28 }
 0x6ba   :  { %4082 = vmatprep.subr.bf16.mxu1 %v4602_v30 }
 0x6bd   :  { %4083 = vmatpush3.bf16.msra.mxu1 %v4603_v31 }
 0x6d1   :  { %v3075_v32 = vpop.f32.mrb[36].mxu0 }
 0x6d2   :  { %v4320_v33 = vpop.f32.mrb[37].mxu0  ;;  %v3076_v60 = vadd.f32 %v3749_v55, %v3075_v32  ;;  %v2674_v32 = vstv %s3724_s0 }
 0x6d3   :  { %v3078_v26 = vpop.f32.mrb[38].mxu0 }
 0x6d4   :  { %v4321_v35 = vpop.f32.mrb[39].mxu0  ;;  %v3081_v63 = vmax.f32 %v3076_v60, 0.0 }
 0x6d6   :  { %v3087_v11 = vmul.f32 %v3758_v3, %v3081_v63 }
 0x6d7   :  { %s4323_s12 = spop %4322 }
 0x6d8   :  { %v2684_v35 = vstv %s4323_s12 }
 0x6f1   :  { %v4106_v36 = vpop.f32.mrb[40].mxu0 }
 0x6f2   :  { %v4107_v37 = vpop.f32.mrb[41].mxu0 }
 0x6f3   :  { %v5462_v38 = vadd.f32 %v4107_v37, %v4106_v36  ;;  %v4109_v39 = vpop.f32.mrb[42].mxu0 }
 0x6f4   :  { %v4110_v40 = vpop.f32.mrb[43].mxu0 }
 0x753   :  { %v4260_v42 = vpop.f32.mrb[32].mxu1 }
 0x754   :  { %v2642_v44 = vpop.f32.mrb[33].mxu1  ;;  %v2651_v45 = vadd.f32 %v4260_v42, %v3714_v2 }
 0x755   :  { %v2643_v47 = vadd.f32 %v3714_v2, %v2642_v44  ;;  %v4261_v48 = vpop.f32.mrb[34].mxu1 }
 0x756   :  { %v2645_v50 = vpop.f32.mrb[35].mxu1  ;;  %v2658_v56 = vmax.f32 %v2651_v45, 0.0 }
 0x757   :  { %v2656_v52 = vmax.f32 %v2643_v47, 0.0  ;;  %v2646_v54 = vadd.f32 %v3714_v2, %v2645_v50 }
 0x758   :  { %v2666_v29 = vmul.f32 %v3723_v51, %v2658_v56 }
 0x759   :  { %v2657_v57 = vmax.f32 %v2646_v54, 0.0  ;;  %v2664_v58 = vmul.f32 %v3723_v51, %v2656_v52  ;;  %v2834_v52 = vstv %s3735_s1  ;;  %v3091_v54 = vstv %s3759_s26 }
 0x75b   :  { %2667 = vadd.xlane.f32.xlu0 %v2664_v58  ;;  %v2665_v61 = vmul.f32 %v3723_v51, %v2657_v57 }
 0x75d   :  { %2669 = vadd.xlane.f32.xlu1 %v2665_v61 }
 0x75f   :  { %2671 = vadd.xlane.f32.xlu0 %v2666_v29 }
 0x761   :  { %2831 = vadd.xlane.f32.xlu1 %v2830_v0  ;;  %v2963_v0 = vstv %s3747_s17 }
 0x765   :  { %3088 = vadd.xlane.f32.xlu1 %v3087_v11 }
 0x773   :  { %v2947_v5 = vpop.f32.mrb[36].mxu1 }
 0x774   :  { %v2948_v6 = vadd.f32 %v3737_v4, %v2947_v5  ;;  %v4300_v46 = vpop.f32.mrb[37].mxu1 }
 0x775   :  { %v2950_v8 = vpop.f32.mrb[38].mxu1 }
 0x776   :  { %v2953_v10 = vmax.f32 %v2948_v6, 0.0  ;;  %v4301_v13 = vpop.f32.mrb[39].mxu1 }
 0x778   :  { %v2959_v14 = vmul.f32 %v3746_v9, %v2953_v10 }
 0x77a   :  { %2960 = vadd.xlane.f32.xlu0 %v2959_v14 }
 0x7e8   :  { %v2668_v33 = vpop.xlane.xlu0 %2667 }
 0x7e9   :  { %v2675_v26 = vadd.f32 %v2674_v32, %v2668_v33 }
 0x7ea   :  { %v2670_v36 = vpop.xlane.xlu1 %2669 }
 0x7eb   :  { %v2676_v37 = vadd.f32 %v2674_v32, %v2670_v36  ;;  %v2685_v40 = vmul.f32 %v2684_v35, %v2675_v26  ;;  %v3104_v36 = vstv %s3103_s11 }
 0x7ec   :  { %v2672_v39 = vpop.xlane.xlu0 %2671 }
 0x7ed   :  { %v2686_v1 = vmul.f32 %v2684_v35, %v2676_v37  ;;  %v2677_v41 = vadd.f32 %v2674_v32, %v2672_v39  ;;  %v3111_v37 = vstv %s3110_s19 }
 0x7ee   :  { %v2832_v51 = vpop.xlane.xlu1 %2831 }
 0x7ef   :  { %v2688_v2 = vmax.f32 %v2685_v40, %v2686_v1  ;;  %v2687_v42 = vmul.f32 %v2684_v35, %v2677_v41  ;;  %v2835_v56 = vadd.f32 %v2834_v52, %v2832_v51  ;;  %v3118_v41 = vstv %s3117_s20 }
 0x7f1   :  { %v2689_v43 = vmax.f32 %v2688_v2, %v2687_v42  ;;  %v3736_v59 = vmul.f32 -1.442695, %v2835_v56 }
 0x7f2   :  { %v3089_v55 = vpop.xlane.xlu1 %3088 }
 0x7f3   :  { %v2690_v44 = vsub.f32 %v2685_v40, %v2689_v43  ;;  %v2693_v45 = vsub.f32 %v2686_v1, %v2689_v43  ;;  %v2696_v47 = vsub.f32 %v2687_v42, %v2689_v43  ;;  %v3092_v57 = vadd.f32 %v3091_v54, %v3089_v55 }
 0x7f5   :  { %v2691_v48 = vmul.f32 1.442695, %v2690_v44  ;;  %v2694_v50 = vmul.f32 1.442695, %v2693_v45  ;;  %v2697_v53 = vmul.f32 1.442695, %v2696_v47 }
 0x7f6   :  { %v3760_v61 = vmul.f32 -1.442695, %v3092_v57 }
 0x7f7   :  { %4612 = vpow2.f32 %v2691_v48 }
 0x7f8   :  { %4614 = vpow2.f32 %v2694_v50 }
 0x7f9   :  { %4616 = vpow2.f32 %v2697_v53 }
 0x7fa   :  { %4618 = vpow2.f32 %v3736_v59 }
 0x7fb   :  { %4620 = vpow2.f32 %v3760_v61  ;;  %v3764_v61 = vld [vmem:[#allocation6 + $0x15] ss:$0 sm:$0xff] }
 0x801   :  { %v4613_v58 = vpop.eup %4612 }
 0x802   :  { %v4615_v60 = vpop.eup %4614 }
 0x803   :  { %v2699_v62 = vadd.f32 %v4615_v60, %v4613_v58  ;;  %v4617_v29 = vpop.eup %4616 }
 0x804   :  { %v4619_v5 = vpop.eup %4618 }
 0x805   :  { %v2700_v63 = vadd.f32 %v4617_v29, %v2699_v62  ;;  %v4621_v6 = vpop.eup %4620  ;;  %v2839_v13 = vadd.f32 1.0, %v4619_v5 }
 0x806   :  { %v3096_v16 = vadd.f32 1.0, %v4621_v6 }
 0x807   :  { %4622 = vrcp.f32 %v2700_v63  ;;  %v2961_v3 = vpop.xlane.xlu0 %2960 }
 0x808   :  { %v2964_v11 = vadd.f32 %v2963_v0, %v2961_v3 }
 0x80a   :  { %v3748_v4 = vmul.f32 -1.442695, %v2964_v11 }
 0x80c   :  { %4624 = vpow2.f32 %v3748_v4 }
 0x80d   :  { %4626 = vrcp.f32 %v2839_v13 }
 0x80e   :  { %4628 = vrcp.f32 %v3096_v16 }
 0x811   :  { %v4623_v46 = vpop.eup %4622 }
 0x812   :  { %v2704_v8 = vmul.f32 %v4623_v46, %v4617_v29  ;;  %v2702_v9 = vmul.f32 %v4623_v46, %v4613_v58  ;;  %v2703_v10 = vmul.f32 %v4623_v46, %v4615_v60 }
 0x814   :  { %v2705_v14 = vmax.f32 %v2702_v9, 0.1  ;;  %v2706_v15 = vmax.f32 %v2703_v10, 0.1  ;;  %v2707_v18 = vmax.f32 %v2704_v8, 0.1 }
 0x816   :  { %v4625_v34 = vpop.eup %4624  ;;  %v2708_v20 = vadd.f32 %v2706_v15, %v2705_v14 }
 0x817   :  { %v2968_v19 = vadd.f32 1.0, %v4625_v34  ;;  %v4627_v22 = vpop.eup %4626 }
 0x818   :  { %v2709_v21 = vadd.f32 %v2708_v20, %v2707_v18  ;;  %v4629_v23 = vpop.eup %4628  ;;  %v3100_v30 = vmul.f32 0.3, %v4627_v22 }
 0x819   :  { %4630 = vrcp.f32 %v2968_v19  ;;  %v3114_v31 = vmul.f32 0.3, %v4629_v23 }
 0x81a   :  { %4632 = vrcp.f32 %v2709_v21 }
 0x823   :  { %v4631_v24 = vpop.eup %4630 }
 0x824   :  { %v4633_v25 = vpop.eup %4632  ;;  %v3107_v32 = vmul.f32 0.3, %v4631_v24 }
 0x825   :  { %v2711_v12 = vmul.f32 %v4633_v25, %v2705_v14  ;;  %v2713_v27 = vmul.f32 %v4633_v25, %v2707_v18  ;;  %v2712_v28 = vmul.f32 %v4633_v25, %v2706_v15 }
 0x827   :  { %v3099_v33 = vmul.f32 0.7, %v2711_v12  ;;  %v3113_v26 = vmul.f32 0.7, %v2713_v27  ;;  %v3106_v35 = vmul.f32 0.7, %v2712_v28 }
 0x829   :  { %v3101_v39 = vadd.f32 %v3100_v30, %v3099_v33  ;;  %v3115_v40 = vadd.f32 %v3114_v31, %v3113_v26  ;;  %v3108_v1 = vadd.f32 %v3107_v32, %v3106_v35 }
 0x82b   :  { %v3105_v2 = vadd.f32 %v3104_v36, %v3101_v39  ;;  %v3112_v42 = vadd.f32 %v3111_v37, %v3108_v1  ;;  %v3119_v43 = vadd.f32 %v3118_v41, %v3115_v40 }
 0x82d   :  { %v3120_v44 = vadd.f32 %v3112_v42, %v3105_v2 }
 0x82f   :  { %v3121_v45 = vadd.f32 %v3120_v44, %v3119_v43 }
 0x831   :  { %4634 = vrcp.f32 %v3121_v45 }
 0x83b   :  { %v4635_v47 = vpop.eup %4634 }
 0x83c   :  { %v3124_v48 = vmul.f32 %v4635_v47, %v3105_v2  ;;  %v3125_v50 = vmul.f32 %v4635_v47, %v3112_v42  ;;  %v3126_v51 = vmul.f32 %v4635_v47, %v3119_v43 }
 0x83e   :  { %v3128_v53 = vmul.f32 %v3125_v50, %v5446_v17  ;;  %v3476_v52 = vsel %vm3475_vm2, %v3124_v48, %v3125_v50  ;;  %v3127_v54 = vmul.f32 %v3124_v48, %v5419_v7  ;;  %v3130_v56 = vmul.f32 %v3126_v51, %v5438_v49 }
 0x83f   :  { %v3478_v55 = vsel %vm3477_vm3, %v3476_v52, %v3126_v51 }
 0x840   :  { %3480 = vrot.lane.b32.xlu0 %v3478_v55, %s4994_s23  ;;  %v3129_v57 = vadd.f32 %v3128_v53, %v3127_v54 }
 0x842   :  { %v3131_v58 = vadd.f32 %v3130_v56, %v3129_v57 }
 0x844   :  { %v3132_v59 = vpack.c.bf16 %v3131_v58, %v3131_v58 }
 0x846   :  { %3427 = vmatmul.mubr.bf16.vlgmr.msra.gmra.mrb[40].mxu1 %v3132_v59 }
 0x8b2   :  { %v3481_v49 = vpop.permute.xlu0 %3480 }
 0x919   :  { %v4084_v60 = vpop.f32.mrb[40].mxu1 }
 0x91a   :  { %v4085_v62 = vpop.f32.mrb[41].mxu1 }
 0x91b   :  { %v4086_v29 = vadd.f32 %v4085_v62, %v4084_v60  ;;  %v4087_v63 = vpop.f32.mrb[42].mxu1 }
 0x91c   :  { %v4088_v0 = vpop.f32.mrb[43].mxu1 }
 0x91d   :  { %v3429_v3 = vadd.f32 %v4086_v29, %v3764_v61 }
 0x91f   :  { %v3469_v7 = vadd.f32 %v5462_v38, %v3429_v3 }
 0x921   :  { %3474 = vst [vmem:[#allocation25] sm:$0xff] %v3469_v7 }
 0x922   :  { %3484 = vst.msk [vmem:[#allocation25] sm:$0xff] %vm3483_vm4, %v3481_v49 }
 0x923   :  { %4943 = shalt.err (!%p4940_p13)
}
 0x924   :  { %s4944_s4 = scalar_lea.hbm %s5496_s16, 128 }
 0x925   :  { %p4945_p0 = scmp.ne.s32.totalorder %s5496_s16, %s4944_s4  ;;  %p4948_p1 = scmp.lt.u32.totalorder %s4944_s4, %s5496_s16 }
 0x927   :  { %p4950_p2 = pnand %p4948_p1, %p4945_p0 }
 0x929   :  { %4953 = shalt.err (!%p4950_p2)
}
 0x92a   :  { %3494 = dma.vmem_to_hbm [thread:$0]  %s3492_s10, 128, %s5496_s16, [#allocation4]  }
 0x92b   :  { %4970 = dma.done.wait [#allocation4], 128  }
 0x92c   :  { %4971 = vsyncadd [#allocation4], 4294967168 }
 0x92d   :  { %3498 = vsyncpa [#allocation3], 1 }
 0x92e   :  { %3499 = vsyncpa [#allocation8], 1 }
 0x92f   :  { %3500 = vsyncpa [#allocation11], 1 }
 0x930   :  { %3501 = vsyncpa [#allocation14], 1 }
 0x931   :  { %3502 = vsyncpa [#allocation17], 1 }
 0x932   :  { %3503 = vsyncpa [#allocation20], 1 }
 0x933   :  { %3504 = vsyncpa [#allocation23], 1 }
 0x934   :  { %3505 = vsyncpa [#allocation4], 1 }
 0x935   :  { %3506 = vsyncpa [#allocation5], 1 }

</bundles_post_ra>
